<compile_context>
chip_gen: v5e
topology: v5e:2x2
jax: 0.10.0
libtpu: 0.0.40
codegen_flags: <defaults>
</compile_context>

<pallas_src>
import jax
import jax.numpy as jnp
from jax.experimental import pallas as pl
from jax.experimental.pallas import tpu as pltpu  # noqa: F401  (TPU backend)

BN_EPS = 1e-5


def _relu_conv1x1_bn_kernel(x_ref, w_ref, gb_ref, o_ref):
    # x_ref:  (N, Cin, P)   NCHW input with spatial dims flattened (P = H*W), f32
    # w_ref:  (Cout, Cin)   1x1 conv weight, bf16 (at rest)
    # gb_ref: (Cout, 2)     BN gamma (col 0) and beta (col 1), f32
    # o_ref:  (N, Cout, P)  NCHW output with spatial dims flattened, f32
    n = x_ref.shape[0]
    cout = w_ref.shape[0]
    p = x_ref.shape[2]
    count = n * p

    w_bf = w_ref[...]  # already bf16 (MXU-native); no in-kernel cast needed

    # Streaming 1x1 conv per image: (Cout,Cin) @ (Cin,P) -> (Cout,P), written
    # directly into o_ref; one-pass BN statistics accumulated on the fly.
    s1 = jnp.zeros((cout, 1), jnp.float32)
    s2 = jnp.zeros((cout, 1), jnp.float32)
    for i in range(n):                                    # n is tiny & static
        xi = jnp.maximum(x_ref[i], 0.0).astype(jnp.bfloat16)   # ReLU + bf16 operand
        yi = jnp.dot(w_bf, xi, preferred_element_type=jnp.float32)  # f32 acc
        o_ref[i] = yi
        s1 = s1 + jnp.sum(yi, axis=1, keepdims=True)
        s2 = s2 + jnp.sum(yi * yi, axis=1, keepdims=True)

    # BatchNorm2d (training-mode) per-channel stats over (N, P): one-pass form.
    inv_count = 1.0 / count
    mean = s1 * inv_count                                 # (Cout, 1)
    var = s2 * inv_count - mean * mean                    # biased variance
    inv_std = jax.lax.rsqrt(var + BN_EPS)

    # Fold gamma/beta into one scale/shift: o = y*scale + shift.
    gamma = gb_ref[:, 0:1]                                # (Cout, 1)
    beta = gb_ref[:, 1:2]                                 # (Cout, 1)
    scale = gamma * inv_std
    shift = beta - mean * scale

    for i in range(n):
        o_ref[i] = o_ref[i] * scale + shift


def relu_conv1x1_bn(x_nchw, weight_oi, gamma, beta):
    """x_nchw: (N, Cin, H, W) f32; weight_oi: (Cout, Cin); gamma/beta: (Cout,)."""
    n, cin, h, w = x_nchw.shape
    cout = weight_oi.shape[0]
    p = h * w

    # Free views only (no transposes): NCHW -> (N, Cin, P).
    x3 = x_nchw.reshape(n, cin, p)
    # bf16 weight at rest: halves the dominant HBM read; f32 accumulation in-kernel.
    w_bf = weight_oi.astype(jnp.bfloat16)
    # Pack gamma/beta into one (Cout, 2) array -> a single tiny DMA.
    gb = jnp.stack([gamma, beta], axis=1)

    cost = pl.CostEstimate(
        flops=2 * cout * cin * n * p,
        transcendentals=cout,
        bytes_accessed=(n * cin * p * 4        # x (f32)
                        + cout * cin * 2       # weight (bf16)
                        + cout * 2 * 4         # gamma/beta
                        + n * cout * p * 4),   # output (f32)
    )

    out3 = pl.pallas_call(
        _relu_conv1x1_bn_kernel,
        out_shape=jax.ShapeDtypeStruct((n, cout, p), jnp.float32),
        in_specs=[
            pl.BlockSpec((n, cin, p), lambda: (0, 0, 0)),
            pl.BlockSpec((cout, cin), lambda: (0, 0)),
            pl.BlockSpec((cout, 2), lambda: (0, 0)),
        ],
        out_specs=pl.BlockSpec((n, cout, p), lambda: (0, 0, 0)),
        cost_estimate=cost,
    )(x3, w_bf, gb)

    # Free view back to NCHW.
    return out3.reshape(n, cout, h, w)


if __name__ == "__main__":
    key = jax.random.PRNGKey(0)
    k_x, k_w = jax.random.split(key)

    # Shapes implied by the module's forward: (1, 1184, 7, 7) input.
    N, CIN, H, W = 1, 1184, 7, 7
    COUT = 128

    x = jax.random.normal(k_x, (N, CIN, H, W), dtype=jnp.float32)
    # Conv2d weight (Cout, Cin, 1, 1) -> squeeze the 1x1 spatial dims.
    conv_w = (jax.random.normal(k_w, (COUT, CIN), dtype=jnp.float32)
              * (1.0 / jnp.sqrt(CIN)))
    bn_gamma = jnp.ones((COUT,), dtype=jnp.float32)   # PyTorch default init
    bn_beta = jnp.zeros((COUT,), dtype=jnp.float32)   # PyTorch default init

    out = relu_conv1x1_bn(x, conv_w, bn_gamma, bn_beta)
    jax.block_until_ready(out)

    assert out.shape == (N, COUT, H, W)
    assert bool(jnp.all(jnp.isfinite(out)))
    print("KERNEL_OK")
</pallas_src>

<mosaic_0001>
module attributes {stable_mosaic.version = 11 : i64} {
  func.func @_relu_conv1x1_bn_kernel(%arg0: memref<1x1184x49xf32, #tpu.memory_space<vmem>>, %arg1: memref<128x1184xbf16, #tpu.memory_space<vmem>>, %arg2: memref<128x2xf32, #tpu.memory_space<vmem>>, %arg3: memref<1x128x49xf32, #tpu.memory_space<vmem>>) attributes {dimension_semantics = [], scalar_prefetch = 0 : i64, scratch_operands = 0 : i64, tpu.core_type = #tpu.core_type<tc>} {
    %c0 = arith.constant 0 : index
    %c0_0 = arith.constant 0 : index
    %0 = vector.load %arg1[%c0, %c0_0] : memref<128x1184xbf16, #tpu.memory_space<vmem>>, vector<128x1184xbf16>
    %cst = arith.constant 0.000000e+00 : f32
    %1 = vector.broadcast %cst : f32 to vector<128x1xf32>
    %cst_1 = arith.constant 0.000000e+00 : f32
    %2 = vector.broadcast %cst_1 : f32 to vector<128x1xf32>
    %c0_2 = arith.constant 0 : index
    %c0_3 = arith.constant 0 : index
    %c0_4 = arith.constant 0 : index
    %3 = vector.load %arg0[%c0_2, %c0_3, %c0_4] : memref<1x1184x49xf32, #tpu.memory_space<vmem>>, vector<1x1184x49xf32>
    %4 = vector.shape_cast %3 : vector<1x1184x49xf32> to vector<1184x49xf32>
    %cst_5 = arith.constant 0.000000e+00 : f32
    %5 = vector.broadcast %cst_5 : f32 to vector<1184x49xf32>
    %6 = arith.maximumf %4, %5 : vector<1184x49xf32>
    %7 = arith.truncf %6 : vector<1184x49xf32> to vector<1184x49xbf16>
    %cst_6 = arith.constant dense<0.000000e+00> : vector<128x49xf32>
    %8 = tpu.matmul %0, %7, %cst_6 {dimension_numbers = #tpu.dot_dimension_numbers<[1], [0], [0], [1], [0, 0, 1, 1], [], []>} : vector<128x1184xbf16>, vector<1184x49xbf16>, vector<128x49xf32> -> vector<128x49xf32>
    %c0_7 = arith.constant 0 : index
    %c0_8 = arith.constant 0 : index
    %c0_9 = arith.constant 0 : index
    %9 = vector.load %arg3[%c0_7, %c0_8, %c0_9] : memref<1x128x49xf32, #tpu.memory_space<vmem>>, vector<1x128x49xf32>
    %10 = vector.shape_cast %9 : vector<1x128x49xf32> to vector<128x49xf32>
    %11 = vector.shape_cast %8 : vector<128x49xf32> to vector<1x128x49xf32>
    tpu.vector_store %arg3[%c0_7, %c0_8, %c0_9], %11 {strides = array<i32>} : memref<1x128x49xf32, #tpu.memory_space<vmem>>, vector<1x128x49xf32>,
    %cst_10 = arith.constant dense<0.000000e+00> : vector<128xf32>
    %12 = vector.multi_reduction <add>, %8, %cst_10 [1] : vector<128x49xf32> to vector<128xf32>
    %13 = vector.shape_cast %12 : vector<128xf32> to vector<128x1xf32>
    %14 = arith.addf %1, %13 : vector<128x1xf32>
    %15 = arith.mulf %8, %8 : vector<128x49xf32>
    %cst_11 = arith.constant dense<0.000000e+00> : vector<128xf32>
    %16 = vector.multi_reduction <add>, %15, %cst_11 [1] : vector<128x49xf32> to vector<128xf32>
    %17 = vector.shape_cast %16 : vector<128xf32> to vector<128x1xf32>
    %18 = arith.addf %2, %17 : vector<128x1xf32>
    %cst_12 = arith.constant 0.0204081628 : f32
    %19 = vector.broadcast %cst_12 : f32 to vector<128x1xf32>
    %20 = arith.mulf %14, %19 : vector<128x1xf32>
    %cst_13 = arith.constant 0.0204081628 : f32
    %21 = vector.broadcast %cst_13 : f32 to vector<128x1xf32>
    %22 = arith.mulf %18, %21 : vector<128x1xf32>
    %23 = arith.mulf %20, %20 : vector<128x1xf32>
    %24 = arith.subf %22, %23 : vector<128x1xf32>
    %cst_14 = arith.constant 9.99999974E-6 : f32
    %25 = vector.broadcast %cst_14 : f32 to vector<128x1xf32>
    %26 = arith.addf %24, %25 : vector<128x1xf32>
    %27 = math.rsqrt %26 : vector<128x1xf32>
    %c0_15 = arith.constant 0 : index
    %c0_16 = arith.constant 0 : index
    %28 = vector.load %arg2[%c0_15, %c0_16] : memref<128x2xf32, #tpu.memory_space<vmem>>, vector<128x1xf32>
    %c0_17 = arith.constant 0 : index
    %c1 = arith.constant 1 : index
    %29 = vector.load %arg2[%c0_17, %c1] : memref<128x2xf32, #tpu.memory_space<vmem>>, vector<128x1xf32>
    %30 = arith.mulf %28, %27 : vector<128x1xf32>
    %31 = arith.mulf %20, %30 : vector<128x1xf32>
    %32 = arith.subf %29, %31 : vector<128x1xf32>
    %c0_18 = arith.constant 0 : index
    %c0_19 = arith.constant 0 : index
    %c0_20 = arith.constant 0 : index
    %33 = vector.load %arg3[%c0_18, %c0_19, %c0_20] : memref<1x128x49xf32, #tpu.memory_space<vmem>>, vector<1x128x49xf32>
    %34 = vector.shape_cast %33 : vector<1x128x49xf32> to vector<128x49xf32>
    %35 = vector.broadcast %30 : vector<128x1xf32> to vector<128x49xf32>
    %36 = arith.mulf %34, %35 : vector<128x49xf32>
    %37 = vector.broadcast %32 : vector<128x1xf32> to vector<128x49xf32>
    %38 = arith.addf %36, %37 : vector<128x49xf32>
    %c0_21 = arith.constant 0 : index
    %c0_22 = arith.constant 0 : index
    %c0_23 = arith.constant 0 : index
    %39 = vector.load %arg3[%c0_21, %c0_22, %c0_23] : memref<1x128x49xf32, #tpu.memory_space<vmem>>, vector<1x128x49xf32>
    %40 = vector.shape_cast %39 : vector<1x128x49xf32> to vector<128x49xf32>
    %41 = vector.shape_cast %38 : vector<128x49xf32> to vector<1x128x49xf32>
    tpu.vector_store %arg3[%c0_21, %c0_22, %c0_23], %41 {strides = array<i32>} : memref<1x128x49xf32, #tpu.memory_space<vmem>>, vector<1x128x49xf32>,
    return
  }
}

</mosaic_0001>

<bundles_post_ra>
// kernel: tpu_custom_call.1
= control target key start
LH: loop header
LB: loop body
LE: loop exit
PB: predicated region body
PF: predicated region fallthrough
CT: control target
= control target key end

     0   :  { %vm857_vm0 = vcmask 261120   ;;  %vm1372_vm1 = vcmask 400384   ;;  %s2595_s5 = smov 1   ;;  %s4106_s0 = inlined_call_operand.vmem [shape: f32[1,1184,49], index: 0, kind: input, shape index: {}]   ;;  %s4107_s1 = inlined_call_operand.vmem [shape: bf16[128,1184], index: 1, kind: input, shape index: {}]   ;;  %s4108_s3 = inlined_call_operand.vmem [shape: f32[1,128,49], index: 3, kind: output, shape index: {}]   ;;  %s4109_s2 = inlined_call_operand.vmem [shape: f32[128,2], index: 2, kind: input, shape index: {}]  }
   0x1   :  { %v109_v0 = vld [vmem:[%s4106_s0 + $0x70] sm:$0xff]  ;;  %v110_v1 = vld [vmem:[%s4106_s0 + $0x78] sm:$0xff]  ;;  %v107_v7 = vld [vmem:[%s4106_s0 + $0x60] sm:$0xff] }
   0x2   :  { %v125_v2 = vld [vmem:[%s4106_s0 + $0xf0] sm:$0xff]  ;;  %v257_v3 = vmax.f32 %v109_v0, 0.0  ;;  %v258_v4 = vmax.f32 %v110_v1, 0.0  ;;  %v126_v5 = vld [vmem:[%s4106_s0 + $0xf8] sm:$0xff]  ;;  %v108_v8 = vld [vmem:[%s4106_s0 + $0x68] sm:$0xff]  ;;  %v255_v10 = vmax.f32 %v107_v7, 0.0 }
   0x3   :  { %v273_v6 = vmax.f32 %v125_v2, 0.0  ;;  %v274_v9 = vmax.f32 %v126_v5, 0.0  ;;  %v256_v11 = vmax.f32 %v108_v8, 0.0  ;;  %v123_v12 = vld [vmem:[%s4106_s0 + $0xe0] sm:$0xff]  ;;  %v124_v13 = vld [vmem:[%s4106_s0 + $0xe8] sm:$0xff]  ;;  %v105_v14 = vld [vmem:[%s4106_s0 + $0x50] sm:$0xff] }
   0x4   :  { %v398_v15 = vpack.c.bf16 %v258_v4, %v257_v3  ;;  %v271_v16 = vmax.f32 %v123_v12, 0.0  ;;  %v272_v17 = vmax.f32 %v124_v13, 0.0  ;;  %v106_v18 = vld [vmem:[%s4106_s0 + $0x58] sm:$0xff]  ;;  %v121_v19 = vld [vmem:[%s4106_s0 + $0xd0] sm:$0xff]  ;;  %v253_v23 = vmax.f32 %v105_v14, 0.0  ;;  %v103_v28 = vld [vmem:[%s4106_s0 + $0x40] sm:$0xff] }
   0x5   :  { %v122_v20 = vld [vmem:[%s4106_s0 + $0xd8] sm:$0xff]  ;;  %v406_v21 = vpack.c.bf16 %v274_v9, %v273_v6  ;;  %v397_v22 = vpack.c.bf16 %v256_v11, %v255_v10  ;;  %v254_v24 = vmax.f32 %v106_v18, 0.0  ;;  %v269_v26 = vmax.f32 %v121_v19, 0.0  ;;  %v104_v29 = vld [vmem:[%s4106_s0 + $0x48] sm:$0xff]  ;;  %v119_v30 = vld [vmem:[%s4106_s0 + $0xc0] sm:$0xff] }
   0x6   :  { %2537 = vmatpush.bf16.msra.mxu2 %v398_v15  ;;  %882 = vmatpush.bf16.msra.mxu0 %v398_v15  ;;  %v405_v25 = vpack.c.bf16 %v272_v17, %v271_v16  ;;  %v270_v27 = vmax.f32 %v122_v20, 0.0  ;;  %v120_v31 = vld [vmem:[%s4106_s0 + $0xc8] sm:$0xff]  ;;  %v251_v33 = vmax.f32 %v103_v28, 0.0  ;;  %v252_v34 = vmax.f32 %v104_v29, 0.0  ;;  %v101_v38 = vld [vmem:[%s4106_s0 + $0x30] sm:$0xff]  ;;  %v102_v39 = vld [vmem:[%s4106_s0 + $0x38] sm:$0xff] }
   0x7   :  { %2545 = vmatpush.bf16.msra.mxu3 %v406_v21  ;;  %931 = vmatpush.bf16.msra.mxu1 %v406_v21  ;;  %v396_v32 = vpack.c.bf16 %v254_v24, %v253_v23  ;;  %v267_v36 = vmax.f32 %v119_v30, 0.0  ;;  %v268_v37 = vmax.f32 %v120_v31, 0.0  ;;  %v117_v40 = vld [vmem:[%s4106_s0 + $0xb0] sm:$0xff]  ;;  %v118_v41 = vld [vmem:[%s4106_s0 + $0xb8] sm:$0xff]  ;;  %v249_v43 = vmax.f32 %v101_v38, 0.0  ;;  %v99_v48 = vld [vmem:[%s4106_s0 + $0x20] sm:$0xff] }
   0x8   :  { %v404_v35 = vpack.c.bf16 %v270_v27, %v269_v26  ;;  %v395_v42 = vpack.c.bf16 %v252_v34, %v251_v33  ;;  %v250_v44 = vmax.f32 %v102_v39, 0.0  ;;  %v265_v46 = vmax.f32 %v117_v40, 0.0  ;;  %v100_v49 = vld [vmem:[%s4106_s0 + $0x28] sm:$0xff]  ;;  %v115_v50 = vld [vmem:[%s4106_s0 + $0xa0] sm:$0xff]  ;;  %v97_v58 = vld [vmem:[%s4106_s0 + $0x10] sm:$0xff] }
   0x9   :  { %v403_v45 = vpack.c.bf16 %v268_v37, %v267_v36  ;;  %v266_v47 = vmax.f32 %v118_v41, 0.0  ;;  %v116_v51 = vld [vmem:[%s4106_s0 + $0xa8] sm:$0xff]  ;;  %v247_v53 = vmax.f32 %v99_v48, 0.0  ;;  %v248_v54 = vmax.f32 %v100_v49, 0.0  ;;  %v98_v59 = vld [vmem:[%s4106_s0 + $0x18] sm:$0xff]  ;;  %v113_v60 = vld [vmem:[%s4106_s0 + $0x90] sm:$0xff] }
   0xa   :  { %2538 = vmatpush.bf16.msra.mxu2 %v397_v22  ;;  %883 = vmatpush.bf16.msra.mxu0 %v397_v22  ;;  %v394_v52 = vpack.c.bf16 %v250_v44, %v249_v43  ;;  %v263_v56 = vmax.f32 %v115_v50, 0.0  ;;  %v264_v57 = vmax.f32 %v116_v51, 0.0  ;;  %v114_v61 = vld [vmem:[%s4106_s0 + $0x98] sm:$0xff]  ;;  %v245_v63 = vmax.f32 %v97_v58, 0.0  ;;  %v95_v1 = vld [vmem:[%s4106_s0] sm:$0xff]  ;;  %v96_v5 = vld [vmem:[%s4106_s0 + $0x8] sm:$0xff] }
   0xb   :  { %2546 = vmatpush.bf16.msra.mxu3 %v405_v25  ;;  %932 = vmatpush.bf16.msra.mxu1 %v405_v25  ;;  %v402_v55 = vpack.c.bf16 %v266_v47, %v265_v46  ;;  %v393_v62 = vpack.c.bf16 %v248_v54, %v247_v53  ;;  %v246_v0 = vmax.f32 %v98_v59, 0.0  ;;  %v261_v3 = vmax.f32 %v113_v60, 0.0  ;;  %v111_v6 = vld [vmem:[%s4106_s0 + $0x80] sm:$0xff]  ;;  %v112_v7 = vld [vmem:[%s4106_s0 + $0x88] sm:$0xff]  ;;  %v141_v8 = vld [vmem:[%s4106_s0 + $0x170] sm:$0xff] }
   0xc   :  { %v401_v2 = vpack.c.bf16 %v264_v57, %v263_v56  ;;  %v262_v4 = vmax.f32 %v114_v61, 0.0  ;;  %v142_v9 = vld [vmem:[%s4106_s0 + $0x178] sm:$0xff]  ;;  %v243_v10 = vmax.f32 %v95_v1, 0.0  ;;  %v157_v11 = vld [vmem:[%s4106_s0 + $0x1f0] sm:$0xff]  ;;  %v244_v14 = vmax.f32 %v96_v5, 0.0  ;;  %v2728_v20 = vld [vmem:[%s4106_s0 + $0x160] sm:$0xff] }
   0xd   :  { %v158_v12 = vld [vmem:[%s4106_s0 + $0x1f8] sm:$0xff]  ;;  %v392_v13 = vpack.c.bf16 %v246_v0, %v245_v63  ;;  %v259_v15 = vmax.f32 %v111_v6, 0.0  ;;  %v260_v16 = vmax.f32 %v112_v7, 0.0  ;;  %v289_v18 = vmax.f32 %v141_v8, 0.0  ;;  %v173_v21 = vld [vmem:[%s4106_s0 + $0x270] sm:$0xff]  ;;  %v140_v34 = vld [vmem:[%s4106_s0 + $0x168] sm:$0xff] }
   0xe   :  { %2539 = vmatpush.bf16.msra.mxu2 %v396_v32  ;;  %884 = vmatpush.bf16.msra.mxu0 %v396_v32  ;;  %v400_v17 = vpack.c.bf16 %v262_v4, %v261_v3  ;;  %v290_v19 = vmax.f32 %v142_v9, 0.0  ;;  %v2736_v22 = vld [vmem:[%s4107_s1 + $0x140] sm:$0xf]  ;;  %v2741_v23 = vld [vmem:[%s4107_s1 + $0x164] sm:$0xf0]  ;;  %v305_v29 = vmax.f32 %v157_v11, 0.0  ;;  %v391_v37 = vpack.c.bf16 %v244_v14, %v243_v10 }
   0xf   :  { %2547 = vmatpush.bf16.msra.mxu3 %v404_v35  ;;  %933 = vmatpush.bf16.msra.mxu1 %v404_v35  ;;  %v2746_v24 = vld [vmem:[%s4107_s1 + $0x144] sm:$0xf]  ;;  %v2751_v25 = vld [vmem:[%s4107_s1 + $0x168] sm:$0xf0]  ;;  %v2756_v26 = vld [vmem:[%s4107_s1] sm:$0xf]  ;;  %v399_v38 = vpack.c.bf16 %v260_v16, %v259_v15  ;;  %v2292_v56 = vor.u32 %v2741_v23, %v2736_v22 }
  0x10   :  { %v2761_v27 = vld [vmem:[%s4107_s1 + $0x24] sm:$0xf0]  ;;  %v2766_v28 = vld [vmem:[%s4107_s1 + $0x4] sm:$0xf]  ;;  %v306_v30 = vmax.f32 %v158_v12, 0.0  ;;  %v174_v31 = vld [vmem:[%s4106_s0 + $0x278] sm:$0xff]  ;;  %v414_v43 = vpack.c.bf16 %v290_v19, %v289_v18  ;;  %v2296_v57 = vor.u32 %v2746_v24, %v2751_v25 }
  0x11   :  { %v189_v32 = vld [vmem:[%s4106_s0 + $0x2f0] sm:$0xff]  ;;  %v190_v33 = vld [vmem:[%s4106_s0 + $0x2f8] sm:$0xff]  ;;  %v155_v35 = vld [vmem:[%s4106_s0 + $0x1e0] sm:$0xff]  ;;  %v287_v40 = vmax.f32 %v2728_v20, 0.0  ;;  %v321_v41 = vmax.f32 %v173_v21, 0.0  ;;  %v322_v44 = vmax.f32 %v174_v31, 0.0  ;;  %v2132_v58 = vor.u32 %v2761_v27, %v2756_v26 }
  0x12   :  { %2540 = vmatpush.bf16.msra.mxu2 %v395_v42  ;;  %885 = vmatpush.bf16.msra.mxu0 %v395_v42  ;;  %v156_v36 = vld [vmem:[%s4106_s0 + $0x1e8] sm:$0xff]  ;;  %v137_v42 = vld [vmem:[%s4106_s0 + $0x150] sm:$0xff]  ;;  %v338_v46 = vmax.f32 %v190_v33, 0.0  ;;  %v138_v47 = vld [vmem:[%s4106_s0 + $0x158] sm:$0xff]  ;;  %v422_v50 = vpack.c.bf16 %v306_v30, %v305_v29  ;;  %v288_v51 = vmax.f32 %v140_v34, 0.0 }
  0x13   :  { %2548 = vmatpush.bf16.msra.mxu3 %v403_v45  ;;  %934 = vmatpush.bf16.msra.mxu1 %v403_v45  ;;  %v2133_v39 = vld [vmem:[%s4107_s1 + $0x28] sm:$0xf0]  ;;  %v337_v45 = vmax.f32 %v189_v32, 0.0  ;;  %v171_v48 = vld [vmem:[%s4106_s0 + $0x260] sm:$0xff]  ;;  %v304_v53 = vmax.f32 %v156_v36, 0.0  ;;  %v153_v60 = vld [vmem:[%s4106_s0 + $0x1d0] sm:$0xff] }
  0x14   :  { %v172_v49 = vld [vmem:[%s4106_s0 + $0x268] sm:$0xff]  ;;  %v187_v54 = vld [vmem:[%s4106_s0 + $0x2e0] sm:$0xff]  ;;  %v2136_v59 = vor.u32 %v2766_v28, %v2133_v39  ;;  %v154_v61 = vld [vmem:[%s4106_s0 + $0x1d8] sm:$0xff]  ;;  %v286_v63 = vmax.f32 %v138_v47, 0.0  ;;  %v319_v0 = vmax.f32 %v171_v48, 0.0  ;;  %v413_v8 = vpack.c.bf16 %v288_v51, %v287_v40 }
  0x15   :  { %v320_v1 = vmax.f32 %v172_v49, 0.0  ;;  %v438_v3 = vpack.c.bf16 %v338_v46, %v337_v45  ;;  %v335_v4 = vmax.f32 %v187_v54, 0.0  ;;  %v135_v6 = vld [vmem:[%s4106_s0 + $0x140] sm:$0xff]  ;;  %v169_v7 = vld [vmem:[%s4106_s0 + $0x250] sm:$0xff]  ;;  %v301_v10 = vmax.f32 %v153_v60, 0.0  ;;  %v170_v12 = vld [vmem:[%s4106_s0 + $0x258] sm:$0xff] }
  0x16   :  { %2541 = vmatpush.bf16.msra.mxu2 %v394_v52  ;;  %886 = vmatpush.bf16.msra.mxu0 %v394_v52  ;;  %v303_v52 = vmax.f32 %v155_v35, 0.0  ;;  %v302_v11 = vmax.f32 %v154_v61, 0.0  ;;  %v186_v14 = vld [vmem:[%s4106_s0 + $0x2d8] sm:$0xff]  ;;  %v136_v15 = vld [vmem:[%s4106_s0 + $0x148] sm:$0xff]  ;;  %v151_v16 = vld [vmem:[%s4106_s0 + $0x1c0] sm:$0xff]  ;;  %v283_v20 = vmax.f32 %v135_v6, 0.0 }
  0x17   :  { %2549 = vmatpush.bf16.msra.mxu3 %v402_v55  ;;  %935 = vmatpush.bf16.msra.mxu1 %v402_v55  ;;  %v188_v55 = vld [vmem:[%s4106_s0 + $0x2e8] sm:$0xff]  ;;  %v429_v19 = vpack.c.bf16 %v320_v1, %v319_v0  ;;  %v317_v21 = vmax.f32 %v169_v7, 0.0  ;;  %v133_v22 = vld [vmem:[%s4106_s0 + $0x130] sm:$0xff]  ;;  %v134_v23 = vld [vmem:[%s4106_s0 + $0x138] sm:$0xff]  ;;  %v318_v25 = vmax.f32 %v170_v12, 0.0  ;;  %v334_v27 = vmax.f32 %v186_v14, 0.0 }
  0x18   :  { %v336_v5 = vmax.f32 %v188_v55, 0.0  ;;  %v421_v9 = vpack.c.bf16 %v304_v53, %v303_v52  ;;  %v149_v28 = vld [vmem:[%s4106_s0 + $0x1b0] sm:$0xff]  ;;  %v150_v29 = vld [vmem:[%s4106_s0 + $0x1b8] sm:$0xff]  ;;  %v167_v30 = vld [vmem:[%s4106_s0 + $0x240] sm:$0xff]  ;;  %v420_v31 = vpack.c.bf16 %v302_v11, %v301_v10  ;;  %v284_v32 = vmax.f32 %v136_v15, 0.0 }
  0x19   :  { %v299_v33 = vmax.f32 %v151_v16, 0.0  ;;  %v168_v35 = vld [vmem:[%s4106_s0 + $0x248] sm:$0xff]  ;;  %v183_v36 = vld [vmem:[%s4106_s0 + $0x2c0] sm:$0xff]  ;;  %v282_v39 = vmax.f32 %v134_v23, 0.0  ;;  %v297_v40 = vmax.f32 %v149_v28, 0.0  ;;  %v428_v46 = vpack.c.bf16 %v318_v25, %v317_v21  ;;  %v165_v49 = vld [vmem:[%s4106_s0 + $0x230] sm:$0xff] }
  0x1a   :  { %2542 = vmatpush.bf16.msra.mxu2 %v393_v62  ;;  %887 = vmatpush.bf16.msra.mxu0 %v393_v62  ;;  %v285_v62 = vmax.f32 %v137_v42, 0.0  ;;  %v437_v24 = vpack.c.bf16 %v336_v5, %v335_v4  ;;  %v315_v42 = vmax.f32 %v167_v30, 0.0  ;;  %v131_v48 = vld [vmem:[%s4106_s0 + $0x120] sm:$0xff]  ;;  %v2512_v51 = vld [vmem:[%s4107_s1 + $0x1b4] sm:$0xf0]  ;;  %v411_v52 = vpack.c.bf16 %v284_v32, %v283_v20  ;;  %v181_v55 = vld [vmem:[%s4106_s0 + $0x2b0] sm:$0xff] }
  0x1b   :  { %2550 = vmatpush.bf16.msra.mxu3 %v401_v2  ;;  %936 = vmatpush.bf16.msra.mxu1 %v401_v2  ;;  %v430_v2 = vpack.c.bf16 %v322_v44, %v321_v41  ;;  %v298_v41 = vmax.f32 %v150_v29, 0.0  ;;  %v331_v44 = vmax.f32 %v183_v36, 0.0  ;;  %v166_v54 = vld [vmem:[%s4106_s0 + $0x238] sm:$0xff]  ;;  %v147_v60 = vld [vmem:[%s4106_s0 + $0x1a0] sm:$0xff]  ;;  %v148_v61 = vld [vmem:[%s4106_s0 + $0x1a8] sm:$0xff]  ;;  %v313_v6 = vmax.f32 %v165_v49, 0.0 }
  0x1c   :  { %v412_v18 = vpack.c.bf16 %v286_v63, %v285_v62  ;;  %v2171_v62 = vld [vmem:[%s4107_s1 + $0x50] sm:$0xf]  ;;  %v2472_v63 = vld [vmem:[%s4107_s1 + $0x74] sm:$0xf0]  ;;  %v2467_v0 = vld [vmem:[%s4107_s1 + $0x54] sm:$0xf] }
  0x1d   :  { %v2173_v5 = vld [vmem:[%s4107_s1 + $0x78] sm:$0xf0]  ;;  %v314_v7 = vmax.f32 %v166_v54, 0.0  ;;  %v279_v10 = vmax.f32 %v131_v48, 0.0  ;;  %v295_v12 = vmax.f32 %v147_v60, 0.0  ;;  %v2172_v15 = vor.u32 %v2472_v63, %v2171_v62  ;;  %v163_v28 = vld [vmem:[%s4106_s0 + $0x220] sm:$0xff] }
  0x1e   :  { %2543 = vmatpush.bf16.msra.mxu2 %v392_v13  ;;  %888 = vmatpush.bf16.msra.mxu0 %v392_v13  ;;  %v185_v13 = vld [vmem:[%s4106_s0 + $0x2d0] sm:$0xff]  ;;  %v130_v23 = vld [vmem:[%s4106_s0 + $0x118] sm:$0xff]  ;;  %v311_v32 = vmax.f32 %v163_v28, 0.0  ;;  %v160_v60 = vld [vmem:[%s4106_s0 + $0x208] sm:$0xff] }
  0x1f   :  { %2551 = vmatpush.bf16.msra.mxu3 %v400_v17  ;;  %937 = vmatpush.bf16.msra.mxu1 %v400_v17  ;;  %v152_v17 = vld [vmem:[%s4106_s0 + $0x1c8] sm:$0xff]  ;;  %v333_v26 = vmax.f32 %v185_v13, 0.0  ;;  %v296_v13 = vmax.f32 %v148_v61, 0.0  ;;  %v278_v25 = vmax.f32 %v130_v23, 0.0  ;;  %v162_v48 = vld [vmem:[%s4106_s0 + $0x218] sm:$0xff]  ;;  %v237_v28 = vld [vmem:[%s4106_s0 + $0x470] sm:$0xff] }
  0x20   :  { %v300_v34 = vmax.f32 %v152_v17, 0.0  ;;  %v2176_v17 = vor.u32 %v2467_v0, %v2173_v5  ;;  %v178_v54 = vld [vmem:[%s4106_s0 + $0x298] sm:$0xff]  ;;  %v2371_v61 = vld [vmem:[%s4107_s1 + $0x1e0] sm:$0xf]  ;;  %v2522_v62 = vld [vmem:[%s4107_s1 + $0x204] sm:$0xf0] }
  0x21   :  { %v436_v47 = vpack.c.bf16 %v334_v27, %v333_v26  ;;  %v417_v21 = vpack.c.bf16 %v296_v13, %v295_v12  ;;  %v145_v26 = vld [vmem:[%s4106_s0 + $0x190] sm:$0xff]  ;;  %v146_v27 = vld [vmem:[%s4106_s0 + $0x198] sm:$0xff]  ;;  %v2517_v63 = vld [vmem:[%s4107_s1 + $0x1e4] sm:$0xf] }
  0x22   :  { %2544 = vmatpush.bf16.msra.mxu2 %v391_v37  ;;  %889 = vmatpush.bf16.msra.mxu0 %v391_v37  ;;  %v184_v37 = vld [vmem:[%s4106_s0 + $0x2c8] sm:$0xff]  ;;  %v419_v53 = vpack.c.bf16 %v300_v34, %v299_v33  ;;  %v293_v29 = vmax.f32 %v145_v26, 0.0  ;;  %v294_v30 = vmax.f32 %v146_v27, 0.0  ;;  %v179_v33 = vld [vmem:[%s4106_s0 + $0x2a0] sm:$0xff] }
  0x23   :  { %2552 = vmatpush.bf16.msra.mxu3 %v399_v38  ;;  %938 = vmatpush.bf16.msra.mxu1 %v399_v38  ;;  %v281_v38 = vmax.f32 %v133_v22, 0.0  ;;  %v332_v45 = vmax.f32 %v184_v37, 0.0  ;;  %v129_v22 = vld [vmem:[%s4106_s0 + $0x110] sm:$0xff]  ;;  %v180_v34 = vld [vmem:[%s4106_s0 + $0x2a8] sm:$0xff]  ;;  %v327_v37 = vmax.f32 %v179_v33, 0.0 }
  0x24   :  { %v241_v33 = vld [vmem:[%s4106_s0 + $0x490] sm:$0xff] }
  0x25   :  { %910 = vmatmul.bf16.vlgmr.msra.gmra.mxu2 %v2292_v56  ;;  %890 = vmatmul.bf16.vlgmr.msra.gmra.mxu0 %v2132_v58  ;;  %v182_v56 = vld [vmem:[%s4106_s0 + $0x2b8] sm:$0xff]  ;;  %v410_v1 = vpack.c.bf16 %v282_v39, %v281_v38  ;;  %v435_v4 = vpack.c.bf16 %v332_v45, %v331_v44  ;;  %v328_v38 = vmax.f32 %v180_v34, 0.0  ;;  %v127_v39 = vld [vmem:[%s4106_s0 + $0x100] sm:$0xff]  ;;  %v144_v45 = vld [vmem:[%s4106_s0 + $0x188] sm:$0xff] }
  0x26   :  { %980 = vmatpush.bf16.msrb.mxu2 %v414_v43  ;;  %959 = vmatmul.bf16.vlgmr.msra.gmra.mxu3 %v2296_v57  ;;  %v316_v43 = vmax.f32 %v168_v35, 0.0  ;;  %v2507_v57 = vld [vmem:[%s4107_s1 + $0x194] sm:$0xf]  ;;  %v2333_v58 = vld [vmem:[%s4107_s1 + $0x1b8] sm:$0xf0] }
  0x27   :  { %1029 = vmatpush.bf16.msrb.mxu3 %v422_v50  ;;  %939 = vmatmul.bf16.vlgmr.msra.gmra.mxu1 %v2136_v59  ;;  %v2331_v50 = vld [vmem:[%s4107_s1 + $0x190] sm:$0xf]  ;;  %v132_v59 = vld [vmem:[%s4106_s0 + $0x128] sm:$0xff]  ;;  %v2336_v16 = vor.u32 %v2507_v57, %v2333_v58  ;;  %v326_v58 = vmax.f32 %v178_v54, 0.0  ;;  %v242_v34 = vld [vmem:[%s4106_s0 + $0x498] sm:$0xff] }
  0x28   :  { %1078 = vmatpush.bf16.msrb.mxu0 %v430_v2  ;;  %1127 = vmatpush.bf16.msrb.mxu1 %v438_v3  ;;  %v418_v2 = vpack.c.bf16 %v298_v41, %v297_v40  ;;  %v427_v3 = vpack.c.bf16 %v316_v43, %v315_v42  ;;  %v280_v11 = vmax.f32 %v132_v59, 0.0  ;;  %v2332_v14 = vor.u32 %v2512_v51, %v2331_v50  ;;  %v128_v40 = vld [vmem:[%s4106_s0 + $0x108] sm:$0xff]  ;;  %v143_v41 = vld [vmem:[%s4106_s0 + $0x180] sm:$0xff] }
  0x29   :  { %v416_v42 = vpack.c.bf16 %v294_v30, %v293_v29  ;;  %v275_v43 = vmax.f32 %v127_v39, 0.0  ;;  %v276_v44 = vmax.f32 %v128_v40, 0.0  ;;  %v433_v50 = vpack.c.bf16 %v328_v38, %v327_v37  ;;  %v159_v59 = vld [vmem:[%s4106_s0 + $0x200] sm:$0xff]  ;;  %v238_v29 = vld [vmem:[%s4106_s0 + $0x478] sm:$0xff]  ;;  %v2411_v40 = vld [vmem:[%s4107_s1 + $0x230] sm:$0xf] }
  0x2a   :  { %981 = vmatpush.bf16.msrb.mxu2 %v413_v8  ;;  %v329_v8 = vmax.f32 %v181_v55, 0.0  ;;  %v409_v20 = vpack.c.bf16 %v280_v11, %v279_v10  ;;  %v292_v51 = vmax.f32 %v144_v45, 0.0  ;;  %v2372_v10 = vor.u32 %v2522_v62, %v2371_v61  ;;  %v2413_v45 = vld [vmem:[%s4107_s1 + $0x258] sm:$0xf0]  ;;  %v219_v54 = vld [vmem:[%s4106_s0 + $0x3e0] sm:$0xff]  ;;  %v236_v61 = vld [vmem:[%s4106_s0 + $0x468] sm:$0xff] }
  0x2b   :  { %1030 = vmatpush.bf16.msrb.mxu3 %v421_v9  ;;  %v330_v9 = vmax.f32 %v182_v56, 0.0  ;;  %v407_v55 = vpack.c.bf16 %v276_v44, %v275_v43  ;;  %v310_v56 = vmax.f32 %v162_v48, 0.0  ;;  %v390_v37 = vmax.f32 %v242_v34, 0.0  ;;  %v2251_v43 = vld [vmem:[%s4107_s1 + $0xf0] sm:$0xf] }
  0x2c   :  { %1079 = vmatpush.bf16.msrb.mxu0 %v429_v19  ;;  %1128 = vmatpush.bf16.msrb.mxu1 %v437_v24  ;;  %v277_v24 = vmax.f32 %v129_v22, 0.0  ;;  %v221_v22 = vld [vmem:[%s4106_s0 + $0x3f0] sm:$0xff]  ;;  %v2492_v44 = vld [vmem:[%s4107_s1 + $0x114] sm:$0xf0]  ;;  %v2474_v34 = vld [vmem:[%s4107_s1 + $0x84] sm:$0xf0] }
  0x2d   :  { %v434_v19 = vpack.c.bf16 %v330_v9, %v329_v8  ;;  %v307_v8 = vmax.f32 %v159_v59, 0.0  ;;  %v308_v9 = vmax.f32 %v160_v60, 0.0  ;;  %v369_v26 = vmax.f32 %v221_v22, 0.0  ;;  %v235_v60 = vld [vmem:[%s4106_s0 + $0x460] sm:$0xff] }
  0x2e   :  { %982 = vmatpush.bf16.msrb.mxu2 %v412_v18  ;;  %v426_v18 = vpack.c.bf16 %v314_v7, %v313_v6  ;;  %v408_v35 = vpack.c.bf16 %v278_v25, %v277_v24  ;;  %v2477_v6 = vld [vmem:[%s4107_s1 + $0xa4] sm:$0xf]  ;;  %v2213_v7 = vld [vmem:[%s4107_s1 + $0xc8] sm:$0xf0]  ;;  %v222_v25 = vld [vmem:[%s4106_s0 + $0x3f8] sm:$0xff] }
  0x2f   :  { %1031 = vmatpush.bf16.msrb.mxu3 %v420_v31  ;;  %v164_v31 = vld [vmem:[%s4106_s0 + $0x228] sm:$0xff]  ;;  %v2216_v13 = vor.u32 %v2477_v6, %v2213_v7  ;;  %v370_v27 = vmax.f32 %v222_v25, 0.0  ;;  %v2147_v6 = vld [vmem:[%s4107_s1 + $0x10] sm:$0xf]  ;;  %v2464_v7 = vld [vmem:[%s4107_s1 + $0x34] sm:$0xf0] }
  0x30   :  { %1080 = vmatpush.bf16.msrb.mxu0 %v428_v46  ;;  %1129 = vmatpush.bf16.msrb.mxu1 %v436_v47  ;;  %v312_v36 = vmax.f32 %v164_v31, 0.0  ;;  %v291_v46 = vmax.f32 %v143_v41, 0.0  ;;  %v161_v47 = vld [vmem:[%s4106_s0 + $0x210] sm:$0xff]  ;;  %v385_v31 = vmax.f32 %v237_v28, 0.0  ;;  %v2532_v41 = vld [vmem:[%s4107_s1 + $0x254] sm:$0xf0] }
  0x31   :  { %v2412_v48 = vor.u32 %v2532_v41, %v2411_v40 }
  0x32   :  { %983 = vmatpush.bf16.msrb.mxu2 %v411_v52  ;;  %v425_v49 = vpack.c.bf16 %v312_v36, %v311_v32  ;;  %v309_v52 = vmax.f32 %v161_v47, 0.0  ;;  %v415_v0 = vpack.c.bf16 %v292_v51, %v291_v46  ;;  %v386_v32 = vmax.f32 %v238_v29, 0.0  ;;  %v2487_v46 = vld [vmem:[%s4107_s1 + $0xf4] sm:$0xf]  ;;  %v2253_v47 = vld [vmem:[%s4107_s1 + $0x118] sm:$0xf0] }
  0x33   :  { %1032 = vmatpush.bf16.msrb.mxu3 %v419_v53  ;;  %v177_v53 = vld [vmem:[%s4106_s0 + $0x290] sm:$0xff]  ;;  %v389_v36 = vmax.f32 %v241_v33, 0.0  ;;  %v2256_v51 = vor.u32 %v2487_v46, %v2253_v47  ;;  %v2187_v33 = vld [vmem:[%s4107_s1 + $0x60] sm:$0xf]  ;;  %v216_v47 = vld [vmem:[%s4106_s0 + $0x3c8] sm:$0xff] }
  0x34   :  { %1081 = vmatpush.bf16.msrb.mxu0 %v427_v3  ;;  %1130 = vmatpush.bf16.msrb.mxu1 %v435_v4  ;;  %v325_v57 = vmax.f32 %v177_v53, 0.0  ;;  %v2482_v3 = vld [vmem:[%s4107_s1 + $0xc4] sm:$0xf0]  ;;  %v424_v4 = vpack.c.bf16 %v310_v56, %v309_v52  ;;  %v462_v38 = vpack.c.bf16 %v386_v32, %v385_v31  ;;  %v203_v52 = vld [vmem:[%s4106_s0 + $0x360] sm:$0xff]  ;;  %v2468_v32 = vld [vmem:[%s4107_s1 + $0x5c] sm:$0xf] }
  0x35   :  { %915 = vmatmul.bf16.gmra.mxu2 %v2332_v14  ;;  %895 = vmatmul.bf16.gmra.mxu0 %v2172_v15  ;;  %v175_v14 = vld [vmem:[%s4106_s0 + $0x280] sm:$0xff]  ;;  %v176_v15 = vld [vmem:[%s4106_s0 + $0x288] sm:$0xff]  ;;  %v464_v39 = vpack.c.bf16 %v390_v37, %v389_v36 }
  0x36   :  { %984 = vmatpush.bf16.msrb.mxu2 %v410_v1  ;;  %964 = vmatmul.bf16.gmra.mxu3 %v2336_v16  ;;  %v2373_v1 = vld [vmem:[%s4107_s1 + $0x208] sm:$0xf0]  ;;  %v432_v5 = vpack.c.bf16 %v326_v58, %v325_v57  ;;  %v423_v16 = vpack.c.bf16 %v308_v9, %v307_v8  ;;  %v367_v58 = vmax.f32 %v219_v54, 0.0  ;;  %v2141_v8 = vld [vmem:[%s4107_s1 + $0x30] sm:$0xf0] }
  0x37   :  { %1033 = vmatpush.bf16.msrb.mxu3 %v418_v2  ;;  %944 = vmatmul.bf16.gmra.mxu1 %v2176_v17  ;;  %v2211_v2 = vld [vmem:[%s4107_s1 + $0xa0] sm:$0xf]  ;;  %v2376_v12 = vor.u32 %v2517_v63, %v2373_v1  ;;  %v323_v17 = vmax.f32 %v175_v14, 0.0  ;;  %v204_v53 = vld [vmem:[%s4106_s0 + $0x368] sm:$0xff]  ;;  %v383_v63 = vmax.f32 %v235_v60, 0.0 }
  0x38   :  { %1082 = vmatpush.bf16.msrb.mxu0 %v426_v18  ;;  %1131 = vmatpush.bf16.msrb.mxu1 %v434_v19  ;;  %v2212_v11 = vor.u32 %v2482_v3, %v2211_v2  ;;  %v324_v18 = vmax.f32 %v176_v15, 0.0  ;;  %v352_v56 = vmax.f32 %v204_v53, 0.0  ;;  %v220_v57 = vld [vmem:[%s4106_s0 + $0x3e8] sm:$0xff]  ;;  %v2459_v9 = vld [vmem:[%s4107_s1 + $0x14] sm:$0xf] }
  0x39   :  { %v368_v59 = vmax.f32 %v220_v57, 0.0  ;;  %v2139_v3 = vld [vmem:[%s4107_s1 + $0x8] sm:$0xf]  ;;  %v201_v15 = vld [vmem:[%s4106_s0 + $0x350] sm:$0xff]  ;;  %v2473_v31 = vld [vmem:[%s4107_s1 + $0x7c] sm:$0xf0] }
  0x3a   :  { %985 = vmatpush.bf16.msrb.mxu2 %v409_v20  ;;  %v431_v19 = vpack.c.bf16 %v324_v18, %v323_v17  ;;  %v205_v20 = vld [vmem:[%s4106_s0 + $0x370] sm:$0xff]  ;;  %v349_v18 = vmax.f32 %v201_v15, 0.0  ;;  %v2469_v36 = vld [vmem:[%s4107_s1 + $0x64] sm:$0xf]  ;;  %v2189_v37 = vld [vmem:[%s4107_s1 + $0x88] sm:$0xf0] }
  0x3b   :  { %1034 = vmatpush.bf16.msrb.mxu3 %v417_v21  ;;  %v206_v21 = vld [vmem:[%s4106_s0 + $0x378] sm:$0xff]  ;;  %v353_v23 = vmax.f32 %v205_v20, 0.0  ;;  %v453_v1 = vpack.c.bf16 %v368_v59, %v367_v58  ;;  %v217_v17 = vld [vmem:[%s4106_s0 + $0x3d0] sm:$0xff]  ;;  %v2192_v41 = vor.u32 %v2469_v36, %v2189_v37  ;;  %v2219_v57 = vld [vmem:[%s4107_s1 + $0xa8] sm:$0xf] }
  0x3c   :  { %1083 = vmatpush.bf16.msrb.mxu0 %v425_v49  ;;  %1132 = vmatpush.bf16.msrb.mxu1 %v433_v50  ;;  %v354_v24 = vmax.f32 %v206_v21, 0.0  ;;  %v2252_v49 = vor.u32 %v2492_v44, %v2251_v43  ;;  %v218_v20 = vld [vmem:[%s4106_s0 + $0x3d8] sm:$0xff]  ;;  %v365_v21 = vmax.f32 %v217_v17, 0.0  ;;  %v200_v43 = vld [vmem:[%s4106_s0 + $0x348] sm:$0xff]  ;;  %v215_v44 = vld [vmem:[%s4106_s0 + $0x3c0] sm:$0xff] }
  0x3d   :  { %v366_v22 = vmax.f32 %v218_v20, 0.0  ;;  %v348_v46 = vmax.f32 %v200_v43, 0.0  ;;  %v2483_v58 = vld [vmem:[%s4107_s1 + $0xcc] sm:$0xf0]  ;;  %v2478_v59 = vld [vmem:[%s4107_s1 + $0xac] sm:$0xf] }
  0x3e   :  { %986 = vmatpush.bf16.msrb.mxu2 %v408_v35  ;;  %v446_v30 = vpack.c.bf16 %v354_v24, %v353_v23  ;;  %v454_v35 = vpack.c.bf16 %v370_v27, %v369_v26  ;;  %v233_v23 = vld [vmem:[%s4106_s0 + $0x450] sm:$0xff]  ;;  %v234_v24 = vld [vmem:[%s4106_s0 + $0x458] sm:$0xff]  ;;  %v195_v37 = vld [vmem:[%s4106_s0 + $0x320] sm:$0xff] }
  0x3f   :  { %1035 = vmatpush.bf16.msrb.mxu3 %v416_v42  ;;  %v2527_v42 = vld [vmem:[%s4107_s1 + $0x234] sm:$0xf]  ;;  %v381_v26 = vmax.f32 %v233_v23, 0.0  ;;  %v382_v27 = vmax.f32 %v234_v24, 0.0  ;;  %v452_v28 = vpack.c.bf16 %v366_v22, %v365_v21  ;;  %v2227_v60 = vld [vmem:[%s4107_s1 + $0xb0] sm:$0xf] }
  0x40   :  { %1084 = vmatpush.bf16.msrb.mxu0 %v424_v4  ;;  %1133 = vmatpush.bf16.msrb.mxu1 %v432_v5  ;;  %v2416_v50 = vor.u32 %v2527_v42, %v2413_v45  ;;  %v2463_v4 = vld [vmem:[%s4107_s1 + $0x2c] sm:$0xf0]  ;;  %v2458_v5 = vld [vmem:[%s4107_s1 + $0xc] sm:$0xf]  ;;  %v199_v42 = vld [vmem:[%s4106_s0 + $0x340] sm:$0xff] }
  0x41   :  { %v460_v29 = vpack.c.bf16 %v382_v27, %v381_v26  ;;  %v347_v45 = vmax.f32 %v199_v42, 0.0  ;;  %v229_v15 = vld [vmem:[%s4106_s0 + $0x430] sm:$0xff]  ;;  %v2259_v17 = vld [vmem:[%s4107_s1 + $0xf8] sm:$0xf]  ;;  %v2488_v21 = vld [vmem:[%s4107_s1 + $0xfc] sm:$0xf] }
  0x42   :  { %987 = vmatpush.bf16.msrb.mxu2 %v407_v55  ;;  %v351_v55 = vmax.f32 %v203_v52, 0.0  ;;  %v2267_v22 = vld [vmem:[%s4107_s1 + $0x100] sm:$0xf]  ;;  %v2494_v23 = vld [vmem:[%s4107_s1 + $0x124] sm:$0xf0] }
  0x43   :  { %1036 = vmatpush.bf16.msrb.mxu3 %v415_v0  ;;  %v384_v0 = vmax.f32 %v236_v61, 0.0  ;;  %v443_v52 = vpack.c.bf16 %v348_v46, %v347_v45  ;;  %v2484_v61 = vld [vmem:[%s4107_s1 + $0xd4] sm:$0xf0]  ;;  %v2261_v24 = vld [vmem:[%s4107_s1 + $0x120] sm:$0xf0]  ;;  %v212_v42 = vld [vmem:[%s4106_s0 + $0x3a8] sm:$0xff] }
  0x44   :  { %1085 = vmatpush.bf16.msrb.mxu0 %v423_v16  ;;  %1134 = vmatpush.bf16.msrb.mxu1 %v431_v19  ;;  %v445_v62 = vpack.c.bf16 %v352_v56, %v351_v55  ;;  %v202_v16 = vld [vmem:[%s4106_s0 + $0x358] sm:$0xff]  ;;  %v2269_v26 = vld [vmem:[%s4107_s1 + $0x128] sm:$0xf0] }
  0x45   :  { %920 = vmatmul.bf16.gmra.mxu2 %v2372_v10  ;;  %900 = vmatmul.bf16.gmra.mxu0 %v2212_v11  ;;  %v461_v2 = vpack.c.bf16 %v384_v0, %v383_v63  ;;  %v2149_v10 = vld [vmem:[%s4107_s1 + $0x38] sm:$0xf0]  ;;  %v2140_v11 = vor.u32 %v2463_v4, %v2139_v3  ;;  %v350_v19 = vmax.f32 %v202_v16, 0.0  ;;  %v2479_v63 = vld [vmem:[%s4107_s1 + $0xb4] sm:$0xf] }
  0x46   :  { %969 = vmatmul.bf16.gmra.mxu3 %v2376_v12  ;;  %1176 = vmatpush.bf16.msra.mxu2 %v446_v30  ;;  %v2148_v12 = vor.u32 %v2464_v7, %v2147_v6  ;;  %v2152_v14 = vor.u32 %v2459_v9, %v2149_v10  ;;  %v2179_v30 = vld [vmem:[%s4107_s1 + $0x58] sm:$0xf]  ;;  %v2229_v0 = vld [vmem:[%s4107_s1 + $0xd8] sm:$0xf0]  ;;  %v213_v7 = vld [vmem:[%s4106_s0 + $0x3b0] sm:$0xff] }
  0x47   :  { %949 = vmatmul.bf16.gmra.mxu1 %v2216_v13  ;;  %1225 = vmatpush.bf16.msra.mxu3 %v454_v35  ;;  %v2144_v13 = vor.u32 %v2458_v5, %v2141_v8  ;;  %v444_v25 = vpack.c.bf16 %v350_v19, %v349_v18  ;;  %v2181_v35 = vld [vmem:[%s4107_s1 + $0x80] sm:$0xf0]  ;;  %v2232_v4 = vor.u32 %v2479_v63, %v2229_v0  ;;  %v197_v5 = vld [vmem:[%s4106_s0 + $0x330] sm:$0xff]  ;;  %v198_v6 = vld [vmem:[%s4106_s0 + $0x338] sm:$0xff]  ;;  %v377_v19 = vmax.f32 %v229_v15, 0.0 }
  0x48   :  { %1274 = vmatpush.bf16.msra.mxu0 %v462_v38  ;;  %1329 = vmatpush.bf16.msra.mxu1 %v464_v39  ;;  %v2180_v38 = vor.u32 %v2473_v31, %v2179_v30  ;;  %v2188_v39 = vor.u32 %v2474_v34, %v2187_v33  ;;  %v2184_v40 = vor.u32 %v2468_v32, %v2181_v35  ;;  %v345_v8 = vmax.f32 %v197_v5, 0.0  ;;  %v214_v10 = vld [vmem:[%s4106_s0 + $0x3b8] sm:$0xff]  ;;  %v2493_v18 = vld [vmem:[%s4107_s1 + $0x11c] sm:$0xf0]  ;;  %v240_v33 = vld [vmem:[%s4106_s0 + $0x488] sm:$0xff] }
  0x49   :  { %v346_v9 = vmax.f32 %v198_v6, 0.0  ;;  %v230_v16 = vld [vmem:[%s4106_s0 + $0x438] sm:$0xff]  ;;  %v2264_v30 = vor.u32 %v2488_v21, %v2261_v24  ;;  %v239_v32 = vld [vmem:[%s4106_s0 + $0x480] sm:$0xff]  ;;  %v388_v35 = vmax.f32 %v240_v33, 0.0  ;;  %v209_v5 = vld [vmem:[%s4106_s0 + $0x390] sm:$0xff] }
  0x4a   :  { %1177 = vmatpush.bf16.msra.mxu2 %v445_v62  ;;  %v2221_v62 = vld [vmem:[%s4107_s1 + $0xd0] sm:$0xf0]  ;;  %v378_v20 = vmax.f32 %v230_v16, 0.0  ;;  %v387_v34 = vmax.f32 %v239_v32, 0.0  ;;  %v2339_v21 = vld [vmem:[%s4107_s1 + $0x198] sm:$0xf] }
  0x4b   :  { %1226 = vmatpush.bf16.msra.mxu3 %v453_v1  ;;  %v2220_v1 = vor.u32 %v2483_v58, %v2219_v57  ;;  %v2224_v3 = vor.u32 %v2478_v59, %v2221_v62  ;;  %v2499_v57 = vld [vmem:[%s4107_s1 + $0x154] sm:$0xf]  ;;  %v2309_v58 = vld [vmem:[%s4107_s1 + $0x178] sm:$0xf0] }
  0x4c   :  { %1275 = vmatpush.bf16.msra.mxu0 %v461_v2  ;;  %v2228_v2 = vor.u32 %v2484_v61, %v2227_v60  ;;  %v458_v27 = vpack.c.bf16 %v378_v20, %v377_v19  ;;  %v463_v36 = vpack.c.bf16 %v388_v35, %v387_v34  ;;  %v2312_v0 = vor.u32 %v2499_v57, %v2309_v58  ;;  %v225_v19 = vld [vmem:[%s4106_s0 + $0x410] sm:$0xff]  ;;  %v226_v20 = vld [vmem:[%s4106_s0 + $0x418] sm:$0xff]  ;;  %v223_v58 = vld [vmem:[%s4106_s0 + $0x400] sm:$0xff] }
  0x4d   :  { %v374_v24 = vmax.f32 %v226_v20, 0.0 }
  0x4e   :  { %1178 = vmatpush.bf16.msra.mxu2 %v444_v25  ;;  %v2489_v25 = vld [vmem:[%s4107_s1 + $0x104] sm:$0xf]  ;;  %1330 = vmatpush.bf16.msra.mxu1 %v463_v36 }
  0x4f   :  { %1227 = vmatpush.bf16.msra.mxu3 %v452_v28  ;;  %v2260_v28 = vor.u32 %v2493_v18, %v2259_v17  ;;  %v2272_v31 = vor.u32 %v2489_v25, %v2269_v26  ;;  %v2508_v25 = vld [vmem:[%s4107_s1 + $0x19c] sm:$0xf]  ;;  %v2347_v26 = vld [vmem:[%s4107_s1 + $0x1a0] sm:$0xf] }
  0x50   :  { %1276 = vmatpush.bf16.msra.mxu0 %v460_v29  ;;  %v2268_v29 = vor.u32 %v2494_v23, %v2267_v22  ;;  %v2513_v22 = vld [vmem:[%s4107_s1 + $0x1bc] sm:$0xf0]  ;;  %v373_v23 = vmax.f32 %v225_v19, 0.0 }
  0x51   :  { %v2340_v34 = vor.u32 %v2513_v22, %v2339_v21 }
  0x52   :  { %1179 = vmatpush.bf16.msra.mxu2 %v443_v52 }
  0x55   :  { %925 = vmatmul.bf16.gmra.mxu2 %v2412_v48  ;;  %905 = vmatmul.bf16.gmra.mxu0 %v2252_v49  ;;  %v363_v48 = vmax.f32 %v215_v44, 0.0  ;;  %v364_v49 = vmax.f32 %v216_v47, 0.0  ;;  %v360_v44 = vmax.f32 %v212_v42, 0.0  ;;  %v227_v47 = vld [vmem:[%s4106_s0 + $0x420] sm:$0xff] }
  0x56   :  { %974 = vmatmul.bf16.gmra.mxu3 %v2416_v50  ;;  %v231_v50 = vld [vmem:[%s4106_s0 + $0x440] sm:$0xff] }
  0x57   :  { %954 = vmatmul.bf16.gmra.mxu1 %v2256_v51  ;;  %v232_v51 = vld [vmem:[%s4106_s0 + $0x448] sm:$0xff]  ;;  %v379_v53 = vmax.f32 %v231_v50, 0.0  ;;  %v451_v55 = vpack.c.bf16 %v364_v49, %v363_v48  ;;  %v2503_v50 = vld [vmem:[%s4107_s1 + $0x16c] sm:$0xf0]  ;;  %v191_v42 = vld [vmem:[%s4106_s0 + $0x300] sm:$0xff] }
  0x58   :  { %v380_v54 = vmax.f32 %v232_v51, 0.0  ;;  %v228_v48 = vld [vmem:[%s4106_s0 + $0x428] sm:$0xff]  ;;  %v375_v51 = vmax.f32 %v227_v47, 0.0 }
  0x59   :  { %1228 = vmatpush.bf16.msra.mxu3 %v451_v55  ;;  %v2299_v49 = vld [vmem:[%s4107_s1 + $0x148] sm:$0xf]  ;;  %v376_v52 = vmax.f32 %v228_v48, 0.0  ;;  %v2504_v55 = vld [vmem:[%s4107_s1 + $0x174] sm:$0xf0] }
  0x5a   :  { %v459_v56 = vpack.c.bf16 %v380_v54, %v379_v53  ;;  %v2498_v53 = vld [vmem:[%s4107_s1 + $0x14c] sm:$0xf]  ;;  %v2307_v54 = vld [vmem:[%s4107_s1 + $0x150] sm:$0xf]  ;;  %v2300_v60 = vor.u32 %v2503_v50, %v2299_v49 }
  0x5b   :  { %v457_v59 = vpack.c.bf16 %v376_v52, %v375_v51  ;;  %v2308_v61 = vor.u32 %v2504_v55, %v2307_v54  ;;  %v208_v47 = vld [vmem:[%s4106_s0 + $0x388] sm:$0xff] }
  0x5c   :  { %1277 = vmatpush.bf16.msra.mxu0 %v459_v56  ;;  %v2301_v56 = vld [vmem:[%s4107_s1 + $0x170] sm:$0xf0]  ;;  %v356_v50 = vmax.f32 %v208_v47, 0.0 }
  0x5d   :  { %v2304_v63 = vor.u32 %v2498_v53, %v2301_v56 }
  0x60   :  { %1278 = vmatpush.bf16.msra.mxu0 %v458_v27  ;;  %v2514_v27 = vld [vmem:[%s4107_s1 + $0x1c4] sm:$0xf0] }
  0x61   :  { %v2348_v35 = vor.u32 %v2514_v27, %v2347_v26  ;;  %v2419_v26 = vld [vmem:[%s4107_s1 + $0x238] sm:$0xf]  ;;  %v2533_v27 = vld [vmem:[%s4107_s1 + $0x25c] sm:$0xf0] }
  0x64   :  { %1279 = vmatpush.bf16.msra.mxu0 %v457_v59  ;;  %v224_v59 = vld [vmem:[%s4106_s0 + $0x408] sm:$0xff] }
  0x65   :  { %988 = vmatmul.bf16.vlgmr.msrb.gmra.mxu2 %v2140_v11  ;;  %1086 = vmatmul.bf16.vlgmr.msrb.gmra.mxu0 %v2148_v12  ;;  %v361_v11 = vmax.f32 %v213_v7, 0.0  ;;  %v362_v12 = vmax.f32 %v214_v10, 0.0 }
  0x66   :  { %1037 = vmatmul.bf16.vlgmr.msrb.gmra.mxu3 %v2144_v13  ;;  %v442_v13 = vpack.c.bf16 %v346_v9, %v345_v8  ;;  %v210_v8 = vld [vmem:[%s4106_s0 + $0x398] sm:$0xff]  ;;  %v357_v9 = vmax.f32 %v209_v5, 0.0  ;;  %v2519_v5 = vld [vmem:[%s4107_s1 + $0x1f4] sm:$0xf] }
  0x67   :  { %1135 = vmatmul.bf16.vlgmr.msrb.gmra.mxu1 %v2152_v14  ;;  %v450_v14 = vpack.c.bf16 %v362_v12, %v361_v11  ;;  %v358_v11 = vmax.f32 %v210_v8, 0.0 }
  0x68   :  { %1180 = vmatpush.bf16.msra.mxu2 %v442_v13 }
  0x69   :  { %1229 = vmatpush.bf16.msra.mxu3 %v450_v14  ;;  %v448_v16 = vpack.c.bf16 %v358_v11, %v357_v9 }
  0x75   :  { %993 = vmatmul.bf16.gmra.mxu2 %v2180_v38  ;;  %1091 = vmatmul.bf16.gmra.mxu0 %v2188_v39  ;;  %v196_v38 = vld [vmem:[%s4106_s0 + $0x328] sm:$0xff]  ;;  %v211_v39 = vld [vmem:[%s4106_s0 + $0x3a0] sm:$0xff] }
  0x76   :  { %1042 = vmatmul.bf16.gmra.mxu3 %v2184_v40  ;;  %v343_v40 = vmax.f32 %v195_v37, 0.0  ;;  %v359_v43 = vmax.f32 %v211_v39, 0.0 }
  0x77   :  { %1140 = vmatmul.bf16.gmra.mxu1 %v2192_v41  ;;  %v344_v41 = vmax.f32 %v196_v38, 0.0 }
  0x78   :  { %v449_v46 = vpack.c.bf16 %v360_v44, %v359_v43  ;;  %v192_v43 = vld [vmem:[%s4106_s0 + $0x308] sm:$0xff]  ;;  %v207_v44 = vld [vmem:[%s4106_s0 + $0x380] sm:$0xff] }
  0x79   :  { %v441_v45 = vpack.c.bf16 %v344_v41, %v343_v40  ;;  %v355_v48 = vmax.f32 %v207_v44, 0.0 }
  0x7a   :  { %1230 = vmatpush.bf16.msra.mxu3 %v449_v46  ;;  %v340_v46 = vmax.f32 %v192_v43, 0.0 }
  0x7b   :  { %1181 = vmatpush.bf16.msra.mxu2 %v441_v45  ;;  %v339_v45 = vmax.f32 %v191_v42, 0.0  ;;  %v447_v55 = vpack.c.bf16 %v356_v50, %v355_v48 }
  0x7d   :  { %v439_v52 = vpack.c.bf16 %v340_v46, %v339_v45 }
  0x7e   :  { %1231 = vmatpush.bf16.msra.mxu3 %v448_v16 }
  0x82   :  { %1232 = vmatpush.bf16.msra.mxu3 %v447_v55  ;;  %v2460_v55 = vld [vmem:[%s4107_s1 + $0x1c] sm:$0xf] }
  0x85   :  { %998 = vmatmul.bf16.gmra.mxu2 %v2220_v1  ;;  %1096 = vmatmul.bf16.gmra.mxu0 %v2228_v2 }
  0x86   :  { %1047 = vmatmul.bf16.gmra.mxu3 %v2224_v3  ;;  %v193_v3 = vld [vmem:[%s4106_s0 + $0x310] sm:$0xff] }
  0x87   :  { %1145 = vmatmul.bf16.gmra.mxu1 %v2232_v4  ;;  %v194_v4 = vld [vmem:[%s4106_s0 + $0x318] sm:$0xff]  ;;  %v341_v6 = vmax.f32 %v193_v3, 0.0 }
  0x88   :  { %v342_v7 = vmax.f32 %v194_v4, 0.0  ;;  %v2524_v3 = vld [vmem:[%s4107_s1 + $0x214] sm:$0xf0]  ;;  %v2381_v4 = vld [vmem:[%s4107_s1 + $0x210] sm:$0xf0] }
  0x8a   :  { %v440_v13 = vpack.c.bf16 %v342_v7, %v341_v6  ;;  %v2389_v6 = vld [vmem:[%s4107_s1 + $0x218] sm:$0xf0] }
  0x8b   :  { %v2392_v16 = vor.u32 %v2519_v5, %v2389_v6 }
  0x8c   :  { %1182 = vmatpush.bf16.msra.mxu2 %v440_v13 }
  0x90   :  { %1183 = vmatpush.bf16.msra.mxu2 %v439_v52  ;;  %v2155_v52 = vld [vmem:[%s4107_s1 + $0x18] sm:$0xf] }
  0x95   :  { %1003 = vmatmul.bf16.gmra.mxu2 %v2260_v28  ;;  %1101 = vmatmul.bf16.gmra.mxu0 %v2268_v29  ;;  %v2341_v28 = vld [vmem:[%s4107_s1 + $0x1c0] sm:$0xf0] }
  0x96   :  { %1052 = vmatmul.bf16.gmra.mxu3 %v2264_v30  ;;  %v2509_v29 = vld [vmem:[%s4107_s1 + $0x1a4] sm:$0xf]  ;;  %v2349_v30 = vld [vmem:[%s4107_s1 + $0x1c8] sm:$0xf0]  ;;  %v2344_v38 = vor.u32 %v2508_v25, %v2341_v28  ;;  %v2528_v28 = vld [vmem:[%s4107_s1 + $0x23c] sm:$0xf] }
  0x97   :  { %1150 = vmatmul.bf16.gmra.mxu1 %v2272_v31  ;;  %v456_v31 = vpack.c.bf16 %v374_v24, %v373_v23  ;;  %v2352_v39 = vor.u32 %v2509_v29, %v2349_v30  ;;  %v2427_v29 = vld [vmem:[%s4107_s1 + $0x240] sm:$0xf]  ;;  %v2534_v30 = vld [vmem:[%s4107_s1 + $0x264] sm:$0xf0] }
  0x99   :  { %1280 = vmatpush.bf16.msra.mxu0 %v456_v31  ;;  %v2421_v31 = vld [vmem:[%s4107_s1 + $0x260] sm:$0xf0] }
  0x9a   :  { %v2424_v42 = vor.u32 %v2528_v28, %v2421_v31 }
  0xa2   :  { %v891_v62 = vpop.f32.mrf.mxu0 }
  0xa4   :  { %v940_v1 = vpop.f32.mrf.mxu1 }
  0xa5   :  { %v3265_v2 = vadd.f32 %v940_v1, %v891_v62  ;;  %1008 = vmatmul.bf16.gmra.mxu2 %v2300_v60  ;;  %1106 = vmatmul.bf16.gmra.mxu0 %v2308_v61  ;;  %v2379_v60 = vld [vmem:[%s4107_s1 + $0x1e8] sm:$0xf]  ;;  %v2523_v61 = vld [vmem:[%s4107_s1 + $0x20c] sm:$0xf0]  ;;  %v371_v62 = vmax.f32 %v223_v58, 0.0 }
  0xa6   :  { %1057 = vmatmul.bf16.gmra.mxu3 %v2304_v63  ;;  %v372_v63 = vmax.f32 %v224_v59, 0.0  ;;  %v2387_v1 = vld [vmem:[%s4107_s1 + $0x1f0] sm:$0xf]  ;;  %v2466_v58 = vld [vmem:[%s4107_s1 + $0x44] sm:$0xf0] }
  0xa7   :  { %1155 = vmatmul.bf16.gmra.mxu1 %v2312_v0  ;;  %v2518_v0 = vld [vmem:[%s4107_s1 + $0x1ec] sm:$0xf]  ;;  %v2388_v11 = vor.u32 %v2524_v3, %v2387_v1  ;;  %v2157_v59 = vld [vmem:[%s4107_s1 + $0x40] sm:$0xf0] }
  0xa8   :  { %v911_v10 = vpop.f32.mrf.mxu2  ;;  %v455_v7 = vpack.c.bf16 %v372_v63, %v371_v62  ;;  %v2160_v5 = vor.u32 %v2460_v55, %v2157_v59  ;;  %v2485_v55 = vld [vmem:[%s4107_s1 + $0xdc] sm:$0xf0]  ;;  %v2237_v59 = vld [vmem:[%s4107_s1 + $0xe0] sm:$0xf0] }
  0xa9   :  { %v960_v12 = vpop.f32.mrf.mxu3 }
  0xaa   :  { %v3279_v14 = vadd.f32 %v960_v12, %v911_v10  ;;  %v893_v15 = vpop.f32.mrf.mxu0  ;;  %v2380_v10 = vor.u32 %v2523_v61, %v2379_v60  ;;  %1281 = vmatpush.bf16.msra.mxu0 %v455_v7  ;;  %v2461_v60 = vld [vmem:[%s4107_s1 + $0x24] sm:$0xf]  ;;  %v2165_v61 = vld [vmem:[%s4107_s1 + $0x48] sm:$0xf0] }
  0xab   :  { %v2168_v6 = vor.u32 %v2461_v60, %v2165_v61  ;;  %v2481_v60 = vld [vmem:[%s4107_s1 + $0xc4] sm:$0xf]  ;;  %v2245_v61 = vld [vmem:[%s4107_s1 + $0xe8] sm:$0xf0] }
  0xac   :  { %v942_v17 = vpop.f32.mrf.mxu1 }
  0xad   :  { %v3281_v18 = vadd.f32 %v942_v17, %v893_v15  ;;  %v2384_v15 = vor.u32 %v2518_v0, %v2381_v4 }
  0xb0   :  { %v913_v32 = vpop.f32.mrf.mxu2 }
  0xb1   :  { %v962_v33 = vpop.f32.mrf.mxu3 }
  0xb2   :  { %v3313_v36 = vadd.f32 %v962_v33, %v913_v32  ;;  %v896_v37 = vpop.f32.mrf.mxu0  ;;  %v2529_v32 = vld [vmem:[%s4107_s1 + $0x244] sm:$0xf]  ;;  %v2429_v33 = vld [vmem:[%s4107_s1 + $0x268] sm:$0xf0] }
  0xb3   :  { %v2432_v43 = vor.u32 %v2529_v32, %v2429_v33 }
  0xb4   :  { %v945_v40 = vpop.f32.mrf.mxu1 }
  0xb5   :  { %v3315_v41 = vadd.f32 %v945_v40, %v896_v37  ;;  %1013 = vmatmul.bf16.gmra.mxu2 %v2340_v34  ;;  %1111 = vmatmul.bf16.gmra.mxu0 %v2348_v35  ;;  %v2420_v37 = vor.u32 %v2533_v27, %v2419_v26  ;;  %v2471_v26 = vld [vmem:[%s4107_s1 + $0x74] sm:$0xf]  ;;  %v2205_v27 = vld [vmem:[%s4107_s1 + $0x98] sm:$0xf0] }
  0xb6   :  { %1062 = vmatmul.bf16.gmra.mxu3 %v2344_v38  ;;  %v2428_v38 = vor.u32 %v2534_v30, %v2427_v29 }
  0xb7   :  { %1160 = vmatmul.bf16.gmra.mxu1 %v2352_v39 }
  0xb8   :  { %v916_v49 = vpop.f32.mrf.mxu2 }
  0xb9   :  { %v965_v51 = vpop.f32.mrf.mxu3 }
  0xba   :  { %v3329_v53 = vadd.f32 %v965_v51, %v916_v49  ;;  %v898_v54 = vpop.f32.mrf.mxu0 }
  0xbc   :  { %v947_v56 = vpop.f32.mrf.mxu1 }
  0xbd   :  { %v3331_v57 = vadd.f32 %v947_v56, %v898_v54  ;;  %v2465_v54 = vld [vmem:[%s4107_s1 + $0x3c] sm:$0xf0] }
  0xbe   :  { %v2163_v56 = vld [vmem:[%s4107_s1 + $0x20] sm:$0xf]  ;;  %v2156_v0 = vor.u32 %v2465_v54, %v2155_v52  ;;  %v2235_v54 = vld [vmem:[%s4107_s1 + $0xb8] sm:$0xf] }
  0xbf   :  { %v2164_v1 = vor.u32 %v2466_v58, %v2163_v56  ;;  %v2480_v56 = vld [vmem:[%s4107_s1 + $0xbc] sm:$0xf]  ;;  %v2486_v58 = vld [vmem:[%s4107_s1 + $0xe4] sm:$0xf0] }
  0xc0   :  { %v918_v8 = vpop.f32.mrf.mxu2 }
  0xc1   :  { %v967_v9 = vpop.f32.mrf.mxu3 }
  0xc2   :  { %v3363_v12 = vadd.f32 %v967_v9, %v918_v8  ;;  %v901_v13 = vpop.f32.mrf.mxu0 }
  0xc4   :  { %v950_v17 = vpop.f32.mrf.mxu1 }
  0xc5   :  { %v3365_v19 = vadd.f32 %v950_v17, %v901_v13  ;;  %1018 = vmatmul.bf16.gmra.mxu2 %v2380_v10  ;;  %1116 = vmatmul.bf16.gmra.mxu0 %v2388_v11  ;;  %v2195_v17 = vld [vmem:[%s4107_s1 + $0x68] sm:$0xf] }
  0xc6   :  { %1067 = vmatmul.bf16.gmra.mxu3 %v2384_v15 }
  0xc7   :  { %1165 = vmatmul.bf16.gmra.mxu1 %v2392_v16 }
  0xc8   :  { %v921_v20 = vpop.f32.mrf.mxu2 }
  0xc9   :  { %v970_v21 = vpop.f32.mrf.mxu3 }
  0xca   :  { %v3367_v22 = vadd.f32 %v970_v21, %v921_v20  ;;  %v903_v23 = vpop.f32.mrf.mxu0  ;;  %v2475_v20 = vld [vmem:[%s4107_s1 + $0x8c] sm:$0xf0]  ;;  %v2470_v21 = vld [vmem:[%s4107_s1 + $0x6c] sm:$0xf] }
  0xcb   :  { %v2196_v32 = vor.u32 %v2475_v20, %v2195_v17 }
  0xcc   :  { %v952_v24 = vpop.f32.mrf.mxu1 }
  0xcd   :  { %v3369_v25 = vadd.f32 %v952_v24, %v903_v23  ;;  %v2476_v23 = vld [vmem:[%s4107_s1 + $0x94] sm:$0xf0]  ;;  %v2197_v24 = vld [vmem:[%s4107_s1 + $0x90] sm:$0xf0] }
  0xd0   :  { %v923_v34 = vpop.f32.mrf.mxu2 }
  0xd1   :  { %v972_v35 = vpop.f32.mrf.mxu3 }
  0xd2   :  { %v3395_v39 = vadd.f32 %v972_v35, %v923_v34  ;;  %v906_v40 = vpop.f32.mrf.mxu0  ;;  %v2200_v35 = vor.u32 %v2470_v21, %v2197_v24  ;;  %v2495_v24 = vld [vmem:[%s4107_s1 + $0x12c] sm:$0xf0] }
  0xd4   :  { %v955_v44 = vpop.f32.mrf.mxu1 }
  0xd5   :  { %v3397_v45 = vadd.f32 %v955_v44, %v906_v40  ;;  %1023 = vmatmul.bf16.gmra.mxu2 %v2420_v37  ;;  %1121 = vmatmul.bf16.gmra.mxu0 %v2428_v38  ;;  %v2208_v37 = vor.u32 %v2471_v26, %v2205_v27  ;;  %v2490_v26 = vld [vmem:[%s4107_s1 + $0x10c] sm:$0xf]  ;;  %v2496_v27 = vld [vmem:[%s4107_s1 + $0x134] sm:$0xf0] }
  0xd6   :  { %1072 = vmatmul.bf16.gmra.mxu3 %v2424_v42 }
  0xd7   :  { %1170 = vmatmul.bf16.gmra.mxu1 %v2432_v43 }
  0xd8   :  { %v926_v46 = vpop.f32.mrf.mxu2 }
  0xd9   :  { %v975_v47 = vpop.f32.mrf.mxu3 }
  0xda   :  { %v3399_v48 = vadd.f32 %v975_v47, %v926_v46  ;;  %v908_v49 = vpop.f32.mrf.mxu0 }
  0xdc   :  { %v957_v50 = vpop.f32.mrf.mxu1 }
  0xdd   :  { %v3401_v51 = vadd.f32 %v957_v50, %v908_v49 }
  0xe0   :  { %v928_v62 = vpop.f32.mrf.mxu2 }
  0xe1   :  { %v977_v63 = vpop.f32.mrf.mxu3 }
  0xe2   :  { %v3427_v3 = vadd.f32 %v977_v63, %v928_v62  ;;  %v1087_v4 = vpop.f32.mrf.mxu0 }
  0xe4   :  { %v1136_v7 = vpop.f32.mrf.mxu1 }
  0xe5   :  { %1184 = vmatmul.bf16.vlgmr.msra.gmra.mxu2 %v2156_v0  ;;  %1282 = vmatmul.bf16.vlgmr.msra.gmra.mxu0 %v2164_v1 }
  0xe6   :  { %1233 = vmatmul.bf16.vlgmr.msra.gmra.mxu3 %v2160_v5 }
  0xe7   :  { %2449 = vmatmul.msk.bf16.vlgmr.msra.gmra.mxu1 %vm857_vm0, %v2168_v6 }
  0xe8   :  { %v989_v8 = vpop.f32.mrf.mxu2 }
  0xe9   :  { %v990_v9 = vadd.f32 %v989_v8, %v3265_v2  ;;  %v1038_v10 = vpop.f32.mrf.mxu3  ;;  %v2203_v2 = vld [vmem:[%s4107_s1 + $0x70] sm:$0xf]  ;;  %v2248_v8 = vor.u32 %v2481_v60, %v2245_v61  ;;  %v2500_v60 = vld [vmem:[%s4107_s1 + $0x15c] sm:$0xf]  ;;  %v2506_v61 = vld [vmem:[%s4107_s1 + $0x184] sm:$0xf0] }
  0xea   :  { %v1089_v11 = vpop.f32.mrf.mxu0  ;;  %v2204_v33 = vor.u32 %v2476_v23, %v2203_v2  ;;  %v2275_v23 = vld [vmem:[%s4107_s1 + $0x108] sm:$0xf] }
  0xeb   :  { %v1039_v13 = vadd.f32 %v1038_v10, %v990_v9 }
  0xec   :  { %v1138_v15 = vpop.f32.mrf.mxu1 }
  0xed   :  { %v1088_v16 = vadd.f32 %v1087_v4, %v1039_v13  ;;  %v2236_v4 = vor.u32 %v2485_v55, %v2235_v54 }
  0xef   :  { %v3455_v28 = vadd.f32 %v1136_v7, %v1088_v16  ;;  %v2240_v7 = vor.u32 %v2480_v56, %v2237_v59  ;;  %v2505_v59 = vld [vmem:[%s4107_s1 + $0x17c] sm:$0xf0] }
  0xf0   :  { %v991_v29 = vpop.f32.mrf.mxu2 }
  0xf1   :  { %v992_v30 = vadd.f32 %v991_v29, %v3281_v18  ;;  %v1040_v31 = vpop.f32.mrf.mxu3  ;;  %v2277_v29 = vld [vmem:[%s4107_s1 + $0x130] sm:$0xf0] }
  0xf2   :  { %v1092_v34 = vpop.f32.mrf.mxu0 }
  0xf3   :  { %v1041_v38 = vadd.f32 %v1040_v31, %v992_v30  ;;  %v2491_v30 = vld [vmem:[%s4107_s1 + $0x114] sm:$0xf]  ;;  %v2285_v31 = vld [vmem:[%s4107_s1 + $0x138] sm:$0xf0] }
  0xf4   :  { %v1141_v40 = vpop.f32.mrf.mxu1 }
  0xf5   :  { %v1090_v42 = vadd.f32 %v1089_v11, %v1041_v38  ;;  %1189 = vmatmul.bf16.gmra.mxu2 %v2196_v32  ;;  %1287 = vmatmul.bf16.gmra.mxu0 %v2204_v33 }
  0xf6   :  { %1238 = vmatmul.bf16.gmra.mxu3 %v2200_v35 }
  0xf7   :  { %2450 = vmatmul.msk.bf16.gmra.mxu1 %vm857_vm0, %v2208_v37  ;;  %v3459_v43 = vadd.f32 %v1138_v15, %v1090_v42  ;;  %v2276_v37 = vor.u32 %v2495_v24, %v2275_v23  ;;  %v2280_v42 = vor.u32 %v2490_v26, %v2277_v29  ;;  %v2515_v29 = vld [vmem:[%s4107_s1 + $0x1cc] sm:$0xf0] }
  0xf8   :  { %v994_v44 = vpop.f32.mrf.mxu2 }
  0xf9   :  { %v995_v46 = vadd.f32 %v994_v44, %v3315_v41  ;;  %v1043_v18 = vpop.f32.mrf.mxu3  ;;  %v2243_v41 = vld [vmem:[%s4107_s1 + $0xc0] sm:$0xf]  ;;  %v2288_v44 = vor.u32 %v2491_v30, %v2285_v31  ;;  %v2510_v30 = vld [vmem:[%s4107_s1 + $0x1ac] sm:$0xf]  ;;  %v2516_v31 = vld [vmem:[%s4107_s1 + $0x1d4] sm:$0xf0] }
  0xfa   :  { %v1094_v47 = vpop.f32.mrf.mxu0  ;;  %v2244_v5 = vor.u32 %v2486_v58, %v2243_v41  ;;  %v2315_v58 = vld [vmem:[%s4107_s1 + $0x158] sm:$0xf] }
  0xfb   :  { %v1044_v49 = vadd.f32 %v1043_v18, %v995_v46 }
  0xfc   :  { %v1143_v50 = vpop.f32.mrf.mxu1 }
  0xfd   :  { %v1093_v52 = vadd.f32 %v1092_v34, %v1044_v49 }
  0xff   :  { %v3486_v62 = vadd.f32 %v1141_v40, %v1093_v52 }
 0x100   :  { %v996_v63 = vpop.f32.mrf.mxu2 }
 0x101   :  { %v997_v0 = vadd.f32 %v996_v63, %v3331_v57  ;;  %v1045_v1 = vpop.f32.mrf.mxu3  ;;  %v2317_v63 = vld [vmem:[%s4107_s1 + $0x180] sm:$0xf0] }
 0x102   :  { %v1097_v6 = vpop.f32.mrf.mxu0 }
 0x103   :  { %v1046_v9 = vadd.f32 %v1045_v1, %v997_v0  ;;  %v2501_v0 = vld [vmem:[%s4107_s1 + $0x164] sm:$0xf]  ;;  %v2325_v1 = vld [vmem:[%s4107_s1 + $0x188] sm:$0xf0] }
 0x104   :  { %v1146_v10 = vpop.f32.mrf.mxu1 }
 0x105   :  { %v1095_v11 = vadd.f32 %v1094_v47, %v1046_v9  ;;  %1194 = vmatmul.bf16.gmra.mxu2 %v2236_v4  ;;  %1292 = vmatmul.bf16.gmra.mxu0 %v2244_v5 }
 0x106   :  { %1243 = vmatmul.bf16.gmra.mxu3 %v2240_v7 }
 0x107   :  { %2451 = vmatmul.msk.bf16.gmra.mxu1 %vm857_vm0, %v2248_v8  ;;  %v3490_v13 = vadd.f32 %v1143_v50, %v1095_v11  ;;  %v2316_v8 = vor.u32 %v2505_v59, %v2315_v58  ;;  %v2320_v11 = vor.u32 %v2500_v60, %v2317_v63  ;;  %v2525_v63 = vld [vmem:[%s4107_s1 + $0x21c] sm:$0xf0] }
 0x108   :  { %v999_v15 = vpop.f32.mrf.mxu2 }
 0x109   :  { %v1000_v16 = vadd.f32 %v999_v15, %v3365_v19  ;;  %v1048_v57 = vpop.f32.mrf.mxu3  ;;  %v2283_v19 = vld [vmem:[%s4107_s1 + $0x110] sm:$0xf]  ;;  %v2328_v15 = vor.u32 %v2501_v0, %v2325_v1  ;;  %v2520_v0 = vld [vmem:[%s4107_s1 + $0x1fc] sm:$0xf]  ;;  %v2526_v1 = vld [vmem:[%s4107_s1 + $0x224] sm:$0xf0] }
 0x10a   :  { %v1099_v17 = vpop.f32.mrf.mxu0  ;;  %v2284_v38 = vor.u32 %v2496_v27, %v2283_v19  ;;  %v2355_v27 = vld [vmem:[%s4107_s1 + $0x1a8] sm:$0xf] }
 0x10b   :  { %v1049_v20 = vadd.f32 %v1048_v57, %v1000_v16 }
 0x10c   :  { %v1148_v21 = vpop.f32.mrf.mxu1 }
 0x10d   :  { %v1098_v2 = vadd.f32 %v1097_v6, %v1049_v20 }
 0x10f   :  { %v3517_v32 = vadd.f32 %v1146_v10, %v1098_v2 }
 0x110   :  { %v1001_v33 = vpop.f32.mrf.mxu2 }
 0x111   :  { %v1002_v34 = vadd.f32 %v1001_v33, %v3369_v25  ;;  %v1050_v35 = vpop.f32.mrf.mxu3  ;;  %v2357_v33 = vld [vmem:[%s4107_s1 + $0x1d0] sm:$0xf0] }
 0x112   :  { %v1102_v40 = vpop.f32.mrf.mxu0 }
 0x113   :  { %v1051_v46 = vadd.f32 %v1050_v35, %v1002_v34  ;;  %v2511_v34 = vld [vmem:[%s4107_s1 + $0x1b4] sm:$0xf]  ;;  %v2365_v35 = vld [vmem:[%s4107_s1 + $0x1d8] sm:$0xf0] }
 0x114   :  { %v1151_v18 = vpop.f32.mrf.mxu1 }
 0x115   :  { %v1100_v47 = vadd.f32 %v1099_v17, %v1051_v46  ;;  %1199 = vmatmul.bf16.gmra.mxu2 %v2276_v37  ;;  %1297 = vmatmul.bf16.gmra.mxu0 %v2284_v38 }
 0x116   :  { %1248 = vmatmul.bf16.gmra.mxu3 %v2280_v42 }
 0x117   :  { %2452 = vmatmul.msk.bf16.gmra.mxu1 %vm857_vm0, %v2288_v44  ;;  %v3521_v49 = vadd.f32 %v1148_v21, %v1100_v47  ;;  %v2356_v44 = vor.u32 %v2515_v29, %v2355_v27  ;;  %v2360_v47 = vor.u32 %v2510_v30, %v2357_v33  ;;  %v2535_v33 = vld [vmem:[%s4107_s1 + $0x26c] sm:$0xf0] }
 0x118   :  { %v1004_v50 = vpop.f32.mrf.mxu2 }
 0x119   :  { %v1005_v52 = vadd.f32 %v1004_v50, %v3397_v45  ;;  %v1053_v25 = vpop.f32.mrf.mxu3  ;;  %v2323_v45 = vld [vmem:[%s4107_s1 + $0x160] sm:$0xf]  ;;  %v2368_v50 = vor.u32 %v2511_v34, %v2365_v35  ;;  %v2530_v34 = vld [vmem:[%s4107_s1 + $0x24c] sm:$0xf]  ;;  %v2536_v35 = vld [vmem:[%s4107_s1 + $0x274] sm:$0xf0] }
 0x11a   :  { %v1104_v54 = vpop.f32.mrf.mxu0  ;;  %v2324_v9 = vor.u32 %v2506_v61, %v2323_v45  ;;  %v2395_v61 = vld [vmem:[%s4107_s1 + $0x1f8] sm:$0xf] }
 0x11b   :  { %v1054_v55 = vadd.f32 %v1053_v25, %v1005_v52 }
 0x11c   :  { %v1153_v56 = vpop.f32.mrf.mxu1 }
 0x11d   :  { %v1103_v41 = vadd.f32 %v1102_v40, %v1054_v55 }
 0x11f   :  { %v3548_v4 = vadd.f32 %v1151_v18, %v1103_v41 }
 0x120   :  { %v1006_v5 = vpop.f32.mrf.mxu2 }
 0x121   :  { %v1007_v6 = vadd.f32 %v1006_v5, %v3401_v51  ;;  %v1055_v7 = vpop.f32.mrf.mxu3  ;;  %v2397_v5 = vld [vmem:[%s4107_s1 + $0x220] sm:$0xf0] }
 0x122   :  { %v1107_v10 = vpop.f32.mrf.mxu0 }
 0x123   :  { %v1056_v16 = vadd.f32 %v1055_v7, %v1007_v6  ;;  %v2521_v6 = vld [vmem:[%s4107_s1 + $0x204] sm:$0xf]  ;;  %v2405_v7 = vld [vmem:[%s4107_s1 + $0x228] sm:$0xf0] }
 0x124   :  { %v1156_v57 = vpop.f32.mrf.mxu1 }
 0x125   :  { %v1105_v17 = vadd.f32 %v1104_v54, %v1056_v16  ;;  %1204 = vmatmul.bf16.gmra.mxu2 %v2316_v8  ;;  %1302 = vmatmul.bf16.gmra.mxu0 %v2324_v9 }
 0x126   :  { %1253 = vmatmul.bf16.gmra.mxu3 %v2320_v11 }
 0x127   :  { %2453 = vmatmul.msk.bf16.gmra.mxu1 %vm857_vm0, %v2328_v15  ;;  %v3552_v20 = vadd.f32 %v1153_v56, %v1105_v17  ;;  %v2396_v15 = vor.u32 %v2525_v63, %v2395_v61  ;;  %v2400_v17 = vor.u32 %v2520_v0, %v2397_v5 }
 0x128   :  { %v1009_v21 = vpop.f32.mrf.mxu2 }
 0x129   :  { %v1010_v2 = vadd.f32 %v1009_v21, %v3279_v14  ;;  %v1058_v51 = vpop.f32.mrf.mxu3  ;;  %v2363_v14 = vld [vmem:[%s4107_s1 + $0x1b0] sm:$0xf]  ;;  %v2408_v21 = vor.u32 %v2521_v6, %v2405_v7 }
 0x12a   :  { %v1109_v23 = vpop.f32.mrf.mxu0  ;;  %v2364_v46 = vor.u32 %v2516_v31, %v2363_v14  ;;  %v2435_v31 = vld [vmem:[%s4107_s1 + $0x248] sm:$0xf] }
 0x12b   :  { %v1059_v24 = vadd.f32 %v1058_v51, %v1010_v2 }
 0x12c   :  { %v1158_v26 = vpop.f32.mrf.mxu1 }
 0x12d   :  { %v1108_v19 = vadd.f32 %v1107_v10, %v1059_v24 }
 0x12f   :  { %v3579_v37 = vadd.f32 %v1156_v57, %v1108_v19 }
 0x130   :  { %v1011_v38 = vpop.f32.mrf.mxu2 }
 0x131   :  { %v1012_v40 = vadd.f32 %v1011_v38, %v3313_v36  ;;  %v1060_v42 = vpop.f32.mrf.mxu3  ;;  %v2437_v38 = vld [vmem:[%s4107_s1 + $0x270] sm:$0xf0] }
 0x132   :  { %v1112_v18 = vpop.f32.mrf.mxu0 }
 0x133   :  { %v1061_v52 = vadd.f32 %v1060_v42, %v1012_v40  ;;  %v2531_v40 = vld [vmem:[%s4107_s1 + $0x254] sm:$0xf]  ;;  %v2445_v42 = vld [vmem:[%s4107_s1 + $0x278] sm:$0xf0] }
 0x134   :  { %v1161_v25 = vpop.f32.mrf.mxu1 }
 0x135   :  { %v1110_v54 = vadd.f32 %v1109_v23, %v1061_v52  ;;  %1209 = vmatmul.bf16.gmra.mxu2 %v2356_v44  ;;  %1307 = vmatmul.bf16.gmra.mxu0 %v2364_v46 }
 0x136   :  { %1258 = vmatmul.bf16.gmra.mxu3 %v2360_v47 }
 0x137   :  { %2454 = vmatmul.msk.bf16.gmra.mxu1 %vm857_vm0, %v2368_v50  ;;  %v3583_v55 = vadd.f32 %v1158_v26, %v1110_v54  ;;  %v2436_v50 = vor.u32 %v2535_v33, %v2435_v31  ;;  %v2440_v54 = vor.u32 %v2530_v34, %v2437_v38 }
 0x138   :  { %v1014_v56 = vpop.f32.mrf.mxu2 }
 0x139   :  { %v1015_v41 = vadd.f32 %v1014_v56, %v3329_v53  ;;  %v1063_v36 = vpop.f32.mrf.mxu3  ;;  %v2403_v53 = vld [vmem:[%s4107_s1 + $0x200] sm:$0xf]  ;;  %v2448_v56 = vor.u32 %v2531_v40, %v2445_v42 }
 0x13a   :  { %v1114_v58 = vpop.f32.mrf.mxu0  ;;  %v2404_v16 = vor.u32 %v2526_v1, %v2403_v53 }
 0x13b   :  { %v1064_v59 = vadd.f32 %v1063_v36, %v1015_v41 }
 0x13c   :  { %v1163_v60 = vpop.f32.mrf.mxu1 }
 0x13d   :  { %v1113_v45 = vadd.f32 %v1112_v18, %v1064_v59 }
 0x13f   :  { %v3610_v8 = vadd.f32 %v1161_v25, %v1113_v45 }
 0x140   :  { %v1016_v9 = vpop.f32.mrf.mxu2 }
 0x141   :  { %v1017_v10 = vadd.f32 %v1016_v9, %v3363_v12  ;;  %v1065_v11 = vpop.f32.mrf.mxu3 }
 0x142   :  { %v1117_v57 = vpop.f32.mrf.mxu0 }
 0x143   :  { %v1066_v2 = vadd.f32 %v1065_v11, %v1017_v10 }
 0x144   :  { %v1166_v51 = vpop.f32.mrf.mxu1 }
 0x145   :  { %v1115_v23 = vadd.f32 %v1114_v58, %v1066_v2  ;;  %1214 = vmatmul.bf16.gmra.mxu2 %v2396_v15  ;;  %1312 = vmatmul.bf16.gmra.mxu0 %v2404_v16 }
 0x146   :  { %1263 = vmatmul.bf16.gmra.mxu3 %v2400_v17 }
 0x147   :  { %2455 = vmatmul.msk.bf16.gmra.mxu1 %vm857_vm0, %v2408_v21  ;;  %v3614_v24 = vadd.f32 %v1163_v60, %v1115_v23 }
 0x148   :  { %v1019_v26 = vpop.f32.mrf.mxu2 }
 0x149   :  { %v1020_v19 = vadd.f32 %v1019_v26, %v3367_v22  ;;  %v1068_v12 = vpop.f32.mrf.mxu3  ;;  %v2443_v22 = vld [vmem:[%s4107_s1 + $0x250] sm:$0xf] }
 0x14a   :  { %v1119_v27 = vpop.f32.mrf.mxu0  ;;  %v2444_v52 = vor.u32 %v2536_v35, %v2443_v22 }
 0x14b   :  { %v1069_v29 = vadd.f32 %v1068_v12, %v1020_v19 }
 0x14c   :  { %v1168_v30 = vpop.f32.mrf.mxu1 }
 0x14d   :  { %v1118_v14 = vadd.f32 %v1117_v57, %v1069_v29 }
 0x14f   :  { %v3641_v44 = vadd.f32 %v1166_v51, %v1118_v14 }
 0x150   :  { %v1021_v46 = vpop.f32.mrf.mxu2 }
 0x151   :  { %v1022_v18 = vadd.f32 %v1021_v46, %v3395_v39  ;;  %v1070_v47 = vpop.f32.mrf.mxu3 }
 0x152   :  { %v1122_v25 = vpop.f32.mrf.mxu0 }
 0x153   :  { %v1071_v41 = vadd.f32 %v1070_v47, %v1022_v18 }
 0x154   :  { %v1171_v36 = vpop.f32.mrf.mxu1 }
 0x155   :  { %v1120_v58 = vadd.f32 %v1119_v27, %v1071_v41  ;;  %1219 = vmatmul.bf16.gmra.mxu2 %v2436_v50  ;;  %1317 = vmatmul.bf16.gmra.mxu0 %v2444_v52 }
 0x156   :  { %1268 = vmatmul.bf16.gmra.mxu3 %v2440_v54 }
 0x157   :  { %2456 = vmatmul.msk.bf16.gmra.mxu1 %vm857_vm0, %v2448_v56  ;;  %v3645_v59 = vadd.f32 %v1168_v30, %v1120_v58 }
 0x158   :  { %v1024_v60 = vpop.f32.mrf.mxu2 }
 0x159   :  { %v1025_v45 = vadd.f32 %v1024_v60, %v3399_v48  ;;  %v1073_v39 = vpop.f32.mrf.mxu3 }
 0x15a   :  { %v1124_v61 = vpop.f32.mrf.mxu0 }
 0x15b   :  { %v1074_v63 = vadd.f32 %v1073_v39, %v1025_v45 }
 0x15c   :  { %v1173_v0 = vpop.f32.mrf.mxu1 }
 0x15d   :  { %v1123_v53 = vadd.f32 %v1122_v25, %v1074_v63 }
 0x15f   :  { %v3648_v1 = vadd.f32 %v1171_v36, %v1123_v53 }
 0x160   :  { %v1026_v5 = vpop.f32.mrf.mxu2 }
 0x161   :  { %v1027_v6 = vadd.f32 %v1026_v5, %v3427_v3  ;;  %v1075_v7 = vpop.f32.mrf.mxu3 }
 0x162   :  { %v1283_v9 = vpop.f32.mrf.mxu0 }
 0x163   :  { %v1076_v10 = vadd.f32 %v1075_v7, %v1027_v6 }
 0x164   :  { %v1332_v11 = vpop.f32.mrf.mxu1 }
 0x165   :  { %v1125_v15 = vadd.f32 %v1124_v61, %v1076_v10 }
 0x167   :  { %v3651_v16 = vadd.f32 %v1173_v0, %v1125_v15 }
 0x168   :  { %v1185_v57 = vpop.f32.mrf.mxu2 }
 0x169   :  { %v1186_v48 = vadd.f32 %v1185_v57, %v3455_v28  ;;  %v1234_v17 = vpop.f32.mrf.mxu3 }
 0x16a   :  { %v1285_v21 = vpop.f32.mrf.mxu0 }
 0x16b   :  { %v1235_v2 = vadd.f32 %v1234_v17, %v1186_v48 }
 0x16c   :  { %v1334_v51 = vpop.f32.mrf.mxu1 }
 0x16d   :  { %v1284_v23 = vadd.f32 %v1283_v9, %v1235_v2 }
 0x16f   :  { %v1333_v26 = vadd.f32 %v1332_v11, %v1284_v23 }
 0x170   :  { %v1187_v19 = vpop.f32.mrf.mxu2 }
 0x171   :  { %v1188_v3 = vadd.f32 %v1187_v19, %v3459_v43  ;;  %v1236_v12 = vpop.f32.mrf.mxu3  ;;  %v1389_v27 = vsel %vm1372_vm1, %v1333_v26, 0.0  ;;  %1373 = vst.msk [vmem:[%s4108_s3] sm:$0xff] %vm1372_vm1, %v1333_v26  ;;  %v1453_v29 = vmul.f32 %v1333_v26, %v1333_v26 }
 0x172   :  { %1390 = vadd.xlane.f32.xlu0 %v1389_v27  ;;  %v1288_v28 = vpop.f32.mrf.mxu0 }
 0x173   :  { %v1237_v30 = vadd.f32 %v1236_v12, %v1188_v3  ;;  %v1469_v14 = vsel %vm1372_vm1, %v1453_v29, 0.0 }
 0x174   :  { %v1337_v31 = vpop.f32.mrf.mxu1  ;;  %1470 = vadd.xlane.f32.xlu1 %v1469_v14 }
 0x175   :  { %v1286_v33 = vadd.f32 %v1285_v21, %v1237_v30 }
 0x177   :  { %v1335_v34 = vadd.f32 %v1334_v51, %v1286_v33 }
 0x178   :  { %v1190_v22 = vpop.f32.mrf.mxu2 }
 0x179   :  { %1374 = vst.msk [vmem:[%s4108_s3 + $0x8] sm:$0xff] %vm1372_vm1, %v1335_v34  ;;  %v1191_v43 = vadd.f32 %v1190_v22, %v3486_v62  ;;  %v1239_v35 = vpop.f32.mrf.mxu3  ;;  %v1392_v38 = vsel %vm1372_vm1, %v1335_v34, 0.0  ;;  %v1454_v40 = vmul.f32 %v1335_v34, %v1335_v34 }
 0x17a   :  { %1393 = vadd.xlane.f32.xlu0 %v1392_v38  ;;  %v1290_v42 = vpop.f32.mrf.mxu0 }
 0x17b   :  { %v1240_v46 = vadd.f32 %v1239_v35, %v1191_v43  ;;  %v1472_v18 = vsel %vm1372_vm1, %v1454_v40, 0.0 }
 0x17c   :  { %v1339_v47 = vpop.f32.mrf.mxu1  ;;  %1473 = vadd.xlane.f32.xlu2 %v1472_v18 }
 0x17d   :  { %v1289_v50 = vadd.f32 %v1288_v28, %v1240_v46 }
 0x17f   :  { %v1338_v52 = vadd.f32 %v1337_v31, %v1289_v50 }
 0x180   :  { %v1192_v25 = vpop.f32.mrf.mxu2 }
 0x181   :  { %1375 = vst.msk [vmem:[%s4108_s3 + $0x10] sm:$0xff] %vm1372_vm1, %v1338_v52  ;;  %v1193_v62 = vadd.f32 %v1192_v25, %v3490_v13  ;;  %v1241_v54 = vpop.f32.mrf.mxu3  ;;  %v1395_v56 = vsel %vm1372_vm1, %v1338_v52, 0.0  ;;  %v1455_v41 = vmul.f32 %v1338_v52, %v1338_v52 }
 0x182   :  { %1396 = vadd.xlane.f32.xlu1 %v1395_v56  ;;  %v1293_v36 = vpop.f32.mrf.mxu0 }
 0x183   :  { %v1242_v58 = vadd.f32 %v1241_v54, %v1193_v62  ;;  %v1475_v60 = vsel %vm1372_vm1, %v1455_v41, 0.0 }
 0x184   :  { %v1342_v45 = vpop.f32.mrf.mxu1  ;;  %1476 = vadd.xlane.f32.xlu0 %v1475_v60 }
 0x185   :  { %v1291_v39 = vadd.f32 %v1290_v42, %v1242_v58 }
 0x187   :  { %v1340_v61 = vadd.f32 %v1339_v47, %v1291_v39 }
 0x188   :  { %v1195_v63 = vpop.f32.mrf.mxu2 }
 0x189   :  { %1376 = vst.msk [vmem:[%s4108_s3 + $0x18] sm:$0xff] %vm1372_vm1, %v1340_v61  ;;  %v1196_v13 = vadd.f32 %v1195_v63, %v3517_v32  ;;  %v1244_v0 = vpop.f32.mrf.mxu3  ;;  %v1398_v53 = vsel %vm1372_vm1, %v1340_v61, 0.0  ;;  %v1456_v10 = vmul.f32 %v1340_v61, %v1340_v61 }
 0x18a   :  { %1399 = vadd.xlane.f32.xlu1 %v1398_v53  ;;  %v1295_v5 = vpop.f32.mrf.mxu0 }
 0x18b   :  { %v1245_v6 = vadd.f32 %v1244_v0, %v1196_v13  ;;  %v1478_v17 = vsel %vm1372_vm1, %v1456_v10, 0.0 }
 0x18c   :  { %v1344_v7 = vpop.f32.mrf.mxu1 }
 0x18d   :  { %v1294_v9 = vadd.f32 %v1293_v36, %v1245_v6 }
 0x18f   :  { %v1343_v11 = vadd.f32 %v1342_v45, %v1294_v9 }
 0x190   :  { %v1197_v15 = vpop.f32.mrf.mxu2 }
 0x191   :  { %1377 = vst.msk [vmem:[%s4108_s3 + $0x20] sm:$0xff] %vm1372_vm1, %v1343_v11  ;;  %v1198_v57 = vadd.f32 %v1197_v15, %v3521_v49  ;;  %v1246_v48 = vpop.f32.mrf.mxu3  ;;  %v1401_v32 = vsel %vm1372_vm1, %v1343_v11, 0.0  ;;  %v1457_v26 = vmul.f32 %v1343_v11, %v1343_v11 }
 0x192   :  { %1402 = vadd.xlane.f32.xlu2 %v1401_v32  ;;  %1479 = vadd.xlane.f32.xlu1 %v1478_v17  ;;  %v1298_v21 = vpop.f32.mrf.mxu0 }
 0x193   :  { %v1247_v2 = vadd.f32 %v1246_v48, %v1198_v57  ;;  %v1481_v27 = vsel %vm1372_vm1, %v1457_v26, 0.0 }
 0x194   :  { %v1347_v51 = vpop.f32.mrf.mxu1 }
 0x195   :  { %v1296_v23 = vadd.f32 %v1295_v5, %v1247_v2 }
 0x197   :  { %v1345_v19 = vadd.f32 %v1344_v7, %v1296_v23 }
 0x198   :  { %v1200_v3 = vpop.f32.mrf.mxu2 }
 0x199   :  { %1378 = vst.msk [vmem:[%s4108_s3 + $0x28] sm:$0xff] %vm1372_vm1, %v1345_v19  ;;  %v1201_v49 = vadd.f32 %v1200_v3, %v3548_v4  ;;  %v1249_v12 = vpop.f32.mrf.mxu3  ;;  %v1458_v29 = vmul.f32 %v1345_v19, %v1345_v19  ;;  %v1404_v35 = vsel %vm1372_vm1, %v1345_v19, 0.0 }
 0x19a   :  { %1482 = vadd.xlane.f32.xlu2 %v1481_v27  ;;  %v1300_v28 = vpop.f32.mrf.mxu0 }
 0x19b   :  { %v1250_v30 = vadd.f32 %v1249_v12, %v1201_v49  ;;  %v1484_v14 = vsel %vm1372_vm1, %v1458_v29, 0.0 }
 0x19c   :  { %v1349_v31 = vpop.f32.mrf.mxu1  ;;  %1485 = vadd.xlane.f32.xlu0 %v1484_v14 }
 0x19d   :  { %v1299_v33 = vadd.f32 %v1298_v21, %v1250_v30 }
 0x19f   :  { %v1348_v34 = vadd.f32 %v1347_v51, %v1299_v33 }
 0x1a0   :  { %v1202_v22 = vpop.f32.mrf.mxu2 }
 0x1a1   :  { %1379 = vst.msk [vmem:[%s4108_s3 + $0x30] sm:$0xff] %vm1372_vm1, %v1348_v34  ;;  %v1203_v4 = vadd.f32 %v1202_v22, %v3552_v20  ;;  %v1251_v43 = vpop.f32.mrf.mxu3  ;;  %v1459_v38 = vmul.f32 %v1348_v34, %v1348_v34  ;;  %v1407_v18 = vsel %vm1372_vm1, %v1348_v34, 0.0 }
 0x1a2   :  { %1405 = vadd.xlane.f32.xlu2 %v1404_v35  ;;  %v1303_v40 = vpop.f32.mrf.mxu0 }
 0x1a3   :  { %v1252_v42 = vadd.f32 %v1251_v43, %v1203_v4  ;;  %v1487_v46 = vsel %vm1372_vm1, %v1459_v38, 0.0 }
 0x1a4   :  { %v1352_v47 = vpop.f32.mrf.mxu1  ;;  %1488 = vadd.xlane.f32.xlu1 %v1487_v46  ;;  %1408 = vadd.xlane.f32.xlu0 %v1407_v18 }
 0x1a5   :  { %v1301_v50 = vadd.f32 %v1300_v28, %v1252_v42 }
 0x1a7   :  { %v1350_v52 = vadd.f32 %v1349_v31, %v1301_v50 }
 0x1a8   :  { %v1205_v25 = vpop.f32.mrf.mxu2 }
 0x1a9   :  { %1380 = vst.msk [vmem:[%s4108_s3 + $0x38] sm:$0xff] %vm1372_vm1, %v1350_v52  ;;  %v1206_v20 = vadd.f32 %v1205_v25, %v3579_v37  ;;  %v1254_v62 = vpop.f32.mrf.mxu3  ;;  %v1460_v54 = vmul.f32 %v1350_v52, %v1350_v52  ;;  %v1410_v58 = vsel %vm1372_vm1, %v1350_v52, 0.0 }
 0x1aa   :  { %v1305_v56 = vpop.f32.mrf.mxu0 }
 0x1ab   :  { %v1255_v41 = vadd.f32 %v1254_v62, %v1206_v20  ;;  %v1490_v36 = vsel %vm1372_vm1, %v1460_v54, 0.0 }
 0x1ac   :  { %v1354_v60 = vpop.f32.mrf.mxu1  ;;  %1491 = vadd.xlane.f32.xlu2 %v1490_v36  ;;  %1411 = vadd.xlane.f32.xlu1 %v1410_v58 }
 0x1ad   :  { %v1304_v45 = vadd.f32 %v1303_v40, %v1255_v41 }
 0x1af   :  { %v1353_v39 = vadd.f32 %v1352_v47, %v1304_v45 }
 0x1b0   :  { %v1207_v61 = vpop.f32.mrf.mxu2 }
 0x1b1   :  { %1381 = vst.msk [vmem:[%s4108_s3 + $0x40] sm:$0xff] %vm1372_vm1, %v1353_v39  ;;  %v1208_v37 = vadd.f32 %v1207_v61, %v3583_v55  ;;  %v1256_v63 = vpop.f32.mrf.mxu3  ;;  %v1461_v13 = vmul.f32 %v1353_v39, %v1353_v39  ;;  %v1413_v6 = vsel %vm1372_vm1, %v1353_v39, 0.0 }
 0x1b2   :  { %v1308_v0 = vpop.f32.mrf.mxu0 }
 0x1b3   :  { %v1257_v53 = vadd.f32 %v1256_v63, %v1208_v37  ;;  %v1493_v5 = vsel %vm1372_vm1, %v1461_v13, 0.0 }
 0x1b4   :  { %1494 = vadd.xlane.f32.xlu0 %v1493_v5  ;;  %1414 = vadd.xlane.f32.xlu2 %v1413_v6  ;;  %v1357_v7 = vpop.f32.mrf.mxu1 }
 0x1b5   :  { %v1306_v9 = vadd.f32 %v1305_v56, %v1257_v53  ;;  %v2594_v53 = vmov 0  }
 0x1b6   :  { %2556 = vset.pattern.permute.xlu0 %v2594_v53  ;;  %2557 = vset.pattern.permute.xlu2 %v2594_v53 }
 0x1b7   :  { %v1355_v10 = vadd.f32 %v1354_v60, %v1306_v9  ;;  %2558 = vset.pattern.permute.xlu1 %v2594_v53 }
 0x1b8   :  { %v1210_v11 = vpop.f32.mrf.mxu2 }
 0x1b9   :  { %1382 = vst.msk [vmem:[%s4108_s3 + $0x48] sm:$0xff] %vm1372_vm1, %v1355_v10  ;;  %v1211_v55 = vadd.f32 %v1210_v11, %v3610_v8  ;;  %v1259_v15 = vpop.f32.mrf.mxu3  ;;  %v1462_v57 = vmul.f32 %v1355_v10, %v1355_v10  ;;  %v1416_v32 = vsel %vm1372_vm1, %v1355_v10, 0.0 }
 0x1ba   :  { %v1310_v21 = vpop.f32.mrf.mxu0 }
 0x1bb   :  { %v1260_v48 = vadd.f32 %v1259_v15, %v1211_v55  ;;  %v1496_v17 = vsel %vm1372_vm1, %v1462_v57, 0.0 }
 0x1bc   :  { %1417 = vadd.xlane.f32.xlu0 %v1416_v32  ;;  %1497 = vadd.xlane.f32.xlu1 %v1496_v17  ;;  %v1359_v51 = vpop.f32.mrf.mxu1 }
 0x1bd   :  { %v1309_v2 = vadd.f32 %v1308_v0, %v1260_v48 }
 0x1bf   :  { %v1358_v23 = vadd.f32 %v1357_v7, %v1309_v2 }
 0x1c0   :  { %v1212_v26 = vpop.f32.mrf.mxu2 }
 0x1c1   :  { %1383 = vst.msk [vmem:[%s4108_s3 + $0x50] sm:$0xff] %vm1372_vm1, %v1358_v23  ;;  %v1213_v8 = vadd.f32 %v1212_v26, %v3614_v24  ;;  %v1261_v19 = vpop.f32.mrf.mxu3  ;;  %v1463_v3 = vmul.f32 %v1358_v23, %v1358_v23  ;;  %v1419_v27 = vsel %vm1372_vm1, %v1358_v23, 0.0 }
 0x1c2   :  { %v1313_v28 = vpop.f32.mrf.mxu0 }
 0x1c3   :  { %v1262_v49 = vadd.f32 %v1261_v19, %v1213_v8  ;;  %v1499_v12 = vsel %vm1372_vm1, %v1463_v3, 0.0 }
 0x1c4   :  { %1500 = vadd.xlane.f32.xlu2 %v1499_v12  ;;  %1420 = vadd.xlane.f32.xlu1 %v1419_v27  ;;  %v1362_v14 = vpop.f32.mrf.mxu1 }
 0x1c5   :  { %v1311_v29 = vadd.f32 %v1310_v21, %v1262_v49 }
 0x1c7   :  { %v1360_v30 = vadd.f32 %v1359_v51, %v1311_v29 }
 0x1c8   :  { %v1215_v31 = vpop.f32.mrf.mxu2 }
 0x1c9   :  { %1384 = vst.msk [vmem:[%s4108_s3 + $0x58] sm:$0xff] %vm1372_vm1, %v1360_v30  ;;  %v1216_v24 = vadd.f32 %v1215_v31, %v3641_v44  ;;  %v1264_v33 = vpop.f32.mrf.mxu3  ;;  %v1464_v34 = vmul.f32 %v1360_v30, %v1360_v30  ;;  %v1422_v43 = vsel %vm1372_vm1, %v1360_v30, 0.0 }
 0x1ca   :  { %v1315_v40 = vpop.f32.mrf.mxu0 }
 0x1cb   :  { %v1265_v22 = vadd.f32 %v1264_v33, %v1216_v24  ;;  %v1502_v4 = vsel %vm1372_vm1, %v1464_v34, 0.0 }
 0x1cc   :  { %1503 = vadd.xlane.f32.xlu0 %v1502_v4  ;;  %1423 = vadd.xlane.f32.xlu2 %v1422_v43  ;;  %v1364_v47 = vpop.f32.mrf.mxu1 }
 0x1cd   :  { %v1314_v35 = vadd.f32 %v1313_v28, %v1265_v22 }
 0x1cf   :  { %v1363_v38 = vadd.f32 %v1362_v14, %v1314_v35 }
 0x1d0   :  { %v1217_v42 = vpop.f32.mrf.mxu2 }
 0x1d1   :  { %1385 = vst.msk [vmem:[%s4108_s3 + $0x60] sm:$0xff] %vm1372_vm1, %v1363_v38  ;;  %v1218_v44 = vadd.f32 %v1217_v42, %v3645_v59  ;;  %v1266_v46 = vpop.f32.mrf.mxu3  ;;  %v1465_v18 = vmul.f32 %v1363_v38, %v1363_v38  ;;  %v1425_v52 = vsel %vm1372_vm1, %v1363_v38, 0.0 }
 0x1d2   :  { %v1318_v36 = vpop.f32.mrf.mxu0 }
 0x1d3   :  { %v1267_v50 = vadd.f32 %v1266_v46, %v1218_v44  ;;  %v1505_v25 = vsel %vm1372_vm1, %v1465_v18, 0.0  ;;  %v3772_v46 = vld [vmem:[%s4109_s2] sm:$0xff] }
 0x1d4   :  { %1426 = vadd.xlane.f32.xlu0 %v1425_v52  ;;  %1506 = vadd.xlane.f32.xlu1 %v1505_v25  ;;  %v1367_v39 = vpop.f32.mrf.mxu1 }
 0x1d5   :  { %v1316_v20 = vadd.f32 %v1315_v40, %v1267_v50 }
 0x1d7   :  { %v1365_v62 = vadd.f32 %v1364_v47, %v1316_v20 }
 0x1d8   :  { %v1220_v54 = vpop.f32.mrf.mxu2 }
 0x1d9   :  { %1386 = vst.msk [vmem:[%s4108_s3 + $0x68] sm:$0xff] %vm1372_vm1, %v1365_v62  ;;  %v1221_v59 = vadd.f32 %v1220_v54, %v3648_v1  ;;  %v1269_v56 = vpop.f32.mrf.mxu3  ;;  %v1466_v41 = vmul.f32 %v1365_v62, %v1365_v62  ;;  %v1428_v45 = vsel %vm1372_vm1, %v1365_v62, 0.0 }
 0x1da   :  { %v1320_v9 = vpop.f32.mrf.mxu0 }
 0x1db   :  { %v1270_v58 = vadd.f32 %v1269_v56, %v1221_v59  ;;  %v1508_v60 = vsel %vm1372_vm1, %v1466_v41, 0.0 }
 0x1dc   :  { %1509 = vadd.xlane.f32.xlu2 %v1508_v60  ;;  %1429 = vadd.xlane.f32.xlu1 %v1428_v45  ;;  %v1369_v55 = vpop.f32.mrf.mxu1 }
 0x1dd   :  { %v1319_v61 = vadd.f32 %v1318_v36, %v1270_v58  ;;  %v3781_v58 = vld [vmem:[%s4109_s2 + $0x8] sm:$0xff] }
 0x1df   :  { %v1368_v37 = vadd.f32 %v1367_v39, %v1319_v61 }
 0x1e0   :  { %v1222_v63 = vpop.f32.mrf.mxu2 }
 0x1e1   :  { %1387 = vst.msk [vmem:[%s4108_s3 + $0x70] sm:$0xff] %vm1372_vm1, %v1368_v37  ;;  %v1223_v1 = vadd.f32 %v1222_v63, %v3651_v16  ;;  %v1467_v13 = vmul.f32 %v1368_v37, %v1368_v37  ;;  %v1271_v0 = vpop.f32.mrf.mxu3  ;;  %v1431_v7 = vsel %vm1372_vm1, %v1368_v37, 0.0 }
 0x1e3   :  { %v1272_v5 = vadd.f32 %v1271_v0, %v1223_v1  ;;  %v1511_v6 = vsel %vm1372_vm1, %v1467_v13, 0.0 }
 0x1e4   :  { %1512 = vadd.xlane.f32.xlu0 %v1511_v6  ;;  %1432 = vadd.xlane.f32.xlu2 %v1431_v7 }
 0x1e5   :  { %v1321_v10 = vadd.f32 %v1320_v9, %v1272_v5  ;;  %v1391_v11 = vpop.xlane.xlu0 %1390  ;;  %v3792_v9 = vld [vmem:[%s4109_s2 + $0x10] sm:$0xff] }
 0x1e6   :  { %v1533_v15 = vmul.f32 0.020408163, %v1391_v11 }
 0x1e7   :  { %v1370_v57 = vadd.f32 %v1369_v55, %v1321_v10  ;;  %v1471_v16 = vpop.xlane.xlu1 %1470 }
 0x1e8   :  { %v1565_v48 = vmul.f32 %v1533_v15, %v1533_v15  ;;  %v1549_v32 = vmul.f32 0.020408163, %v1471_v16 }
 0x1e9   :  { %1388 = vst.msk [vmem:[%s4108_s3 + $0x78] sm:$0xff] %vm1372_vm1, %v1370_v57  ;;  %v1468_v17 = vmul.f32 %v1370_v57, %v1370_v57  ;;  %v1434_v2 = vsel %vm1372_vm1, %v1370_v57, 0.0 }
 0x1ea   :  { %v1581_v21 = vsub.f32 %v1549_v32, %v1565_v48 }
 0x1eb   :  { %v1514_v51 = vsel %vm1372_vm1, %v1468_v17, 0.0 }
 0x1ec   :  { %v1597_v23 = vadd.f32 1e-05, %v1581_v21  ;;  %1435 = vadd.xlane.f32.xlu0 %v1434_v2  ;;  %1515 = vadd.xlane.f32.xlu1 %v1514_v51 }
 0x1ed   :  { %v1394_v26 = vpop.xlane.xlu0 %1393 }
 0x1ee   :  { %2562 = vrsqrt.f32 %v1597_v23  ;;  %v1534_v8 = vmul.f32 0.020408163, %v1394_v26  ;;  %vm1619_vm3 = vweird.f32 %v1597_v23 }
 0x1ef   :  { %v1474_v19 = vpop.xlane.xlu2 %1473 }
 0x1f0   :  { %v1566_v3 = vmul.f32 %v1534_v8, %v1534_v8  ;;  %v1550_v49 = vmul.f32 0.020408163, %v1474_v19 }
 0x1f2   :  { %v1582_v12 = vsub.f32 %v1550_v49, %v1566_v3 }
 0x1f4   :  { %v2563_v27 = vpop.eup %2562  ;;  %v1598_v29 = vadd.f32 1e-05, %v1582_v12 }
 0x1f5   :  { %v1614_v28 = vmul.f32 %v2563_v27, %v1597_v23  ;;  %v1397_v30 = vpop.xlane.xlu1 %1396  ;;  %vm1620_vm2 = vweird.f32 %v2563_v27 }
 0x1f6   :  { %2564 = vrsqrt.f32 %v1598_v29  ;;  %v3765_v14 = vmul.f32 0.020408163, %v1397_v30  ;;  %vm1621_vm4 = vmor %vm1619_vm3, %vm1620_vm2  ;;  %vm1629_vm6 = vweird.f32 %v1598_v29 }
 0x1f7   :  { %v1615_v31 = vmul.f32 %v2563_v27, %v1614_v28  ;;  %v1477_v24 = vpop.xlane.xlu0 %1476 }
 0x1f8   :  { %v1567_v33 = vmul.f32 %v3765_v14, %v3765_v14  ;;  %v1551_v34 = vmul.f32 0.020408163, %v1477_v24 }
 0x1f9   :  { %v1616_v22 = vmul.f32 0.5, %v1615_v31 }
 0x1fa   :  { %v1583_v4 = vsub.f32 %v1551_v34, %v1567_v33  ;;  %v3810_v34 = vld [vmem:[%s4109_s2 + $0x18] sm:$0xff] }
 0x1fb   :  { %v1617_v43 = vsub.f32 1.5, %v1616_v22 }
 0x1fc   :  { %v2565_v35 = vpop.eup %2564  ;;  %v1599_v38 = vadd.f32 1e-05, %v1583_v4 }
 0x1fd   :  { %v1624_v40 = vmul.f32 %v2565_v35, %v1598_v29  ;;  %v1400_v42 = vpop.xlane.xlu1 %1399  ;;  %v1618_v44 = vmul.f32 %v2563_v27, %v1617_v43  ;;  %vm1630_vm5 = vweird.f32 %v2565_v35 }
 0x1fe   :  { %2566 = vrsqrt.f32 %v1599_v38  ;;  %v3775_v25 = vmul.f32 0.020408163, %v1400_v42  ;;  %vm1631_vm7 = vmor %vm1629_vm6, %vm1630_vm5  ;;  %vm1639_vm9 = vweird.f32 %v1599_v38 }
 0x1ff   :  { %v1625_v18 = vmul.f32 %v2565_v35, %v1624_v40  ;;  %v1622_v47 = vsel %vm1621_vm4, %v2563_v27, %v1618_v44 }
 0x200   :  { %v1789_v50 = vmul.f32 %v3772_v46, %v1622_v47  ;;  %v1568_v60 = vmul.f32 %v3775_v25, %v3775_v25 }
 0x201   :  { %v1626_v52 = vmul.f32 0.5, %v1625_v18 }
 0x202   :  { %1919 = vperm.xlu0 %2556, %v1789_v50   ;;  %v1805_v20 = vmul.f32 %v1789_v50, %v1533_v15 }
 0x203   :  { %v1627_v62 = vsub.f32 1.5, %v1626_v52 }
 0x204   :  { %v2567_v54 = vpop.eup %2566  ;;  %1837 = vrot.lane.b32.xlu2 %v1805_v20, %s2595_s5 }
 0x205   :  { %v1634_v59 = vmul.f32 %v2567_v54, %v1599_v38  ;;  %v1403_v56 = vpop.xlane.xlu2 %1402  ;;  %v1480_v41 = vpop.xlane.xlu1 %1479  ;;  %v1628_v36 = vmul.f32 %v2565_v35, %v1627_v62  ;;  %vm1640_vm8 = vweird.f32 %v2567_v54  ;;  %v3820_v62 = vld [vmem:[%s4109_s2 + $0x20] sm:$0xff] }
 0x206   :  { %v1552_v45 = vmul.f32 0.020408163, %v1480_v41  ;;  %v3786_v13 = vmul.f32 0.020408163, %v1403_v56  ;;  %vm1641_vm10 = vmor %vm1639_vm9, %vm1640_vm8 }
 0x207   :  { %v1635_v39 = vmul.f32 %v2567_v54, %v1634_v59  ;;  %v1632_v61 = vsel %vm1631_vm7, %v2565_v35, %v1628_v36 }
 0x208   :  { %v1584_v37 = vsub.f32 %v1552_v45, %v1568_v60  ;;  %v1790_v63 = vmul.f32 %v3781_v58, %v1632_v61  ;;  %v1569_v10 = vmul.f32 %v3786_v13, %v3786_v13 }
 0x209   :  { %v1636_v1 = vmul.f32 0.5, %v1635_v39 }
 0x20a   :  { %v1600_v0 = vadd.f32 1e-05, %v1584_v37  ;;  %v1806_v53 = vmul.f32 %v1790_v63, %v1534_v8 }
 0x20b   :  { %v1637_v5 = vsub.f32 1.5, %v1636_v1 }
 0x20c   :  { %2568 = vrsqrt.f32 %v1600_v0  ;;  %1839 = vrot.lane.b32.xlu0 %v1806_v53, %s2595_s5  ;;  %1924 = vperm.xlu2 %2557, %v1790_v63   ;;  %vm1649_vm12 = vweird.f32 %v1600_v0 }
 0x20d   :  { %v1483_v6 = vpop.xlane.xlu2 %1482  ;;  %v1638_v7 = vmul.f32 %v2567_v54, %v1637_v5 }
 0x20e   :  { %v1553_v11 = vmul.f32 0.020408163, %v1483_v6 }
 0x20f   :  { %v1486_v55 = vpop.xlane.xlu0 %1485  ;;  %v1642_v15 = vsel %vm1641_vm10, %v2567_v54, %v1638_v7 }
 0x210   :  { %v1585_v57 = vsub.f32 %v1553_v11, %v1569_v10  ;;  %v1791_v16 = vmul.f32 %v3792_v9, %v1642_v15  ;;  %v1554_v19 = vmul.f32 0.020408163, %v1486_v55  ;;  %v3834_v15 = vld [vmem:[%s4109_s2 + $0x28] sm:$0xff] }
 0x212   :  { %v2569_v48 = vpop.eup %2568  ;;  %v1601_v32 = vadd.f32 1e-05, %v1585_v57  ;;  %1929 = vperm.xlu1 %2558, %v1791_v16   ;;  %v1807_v12 = vmul.f32 %v1791_v16, %v3765_v14 }
 0x213   :  { %v1644_v17 = vmul.f32 %v2569_v48, %v1600_v0  ;;  %vm1650_vm11 = vweird.f32 %v2569_v48 }
 0x214   :  { %2570 = vrsqrt.f32 %v1601_v32  ;;  %vm1651_vm13 = vmor %vm1649_vm12, %vm1650_vm11  ;;  %vm1659_vm15 = vweird.f32 %v1601_v32 }
 0x215   :  { %v1645_v21 = vmul.f32 %v2569_v48, %v1644_v17  ;;  %v1406_v2 = vpop.xlane.xlu2 %1405  ;;  %v3839_v17 = vld [vmem:[%s4109_s2 + $0x30] sm:$0xff] }
 0x216   :  { %v3797_v51 = vmul.f32 0.020408163, %v1406_v2 }
 0x217   :  { %v1646_v23 = vmul.f32 0.5, %v1645_v21  ;;  %v1489_v26 = vpop.xlane.xlu1 %1488  ;;  %v1409_v8 = vpop.xlane.xlu0 %1408 }
 0x218   :  { %v1570_v3 = vmul.f32 %v3797_v51, %v3797_v51  ;;  %v3801_v49 = vmul.f32 0.020408163, %v1409_v8  ;;  %v1555_v30 = vmul.f32 0.020408163, %v1489_v26 }
 0x219   :  { %v1647_v27 = vsub.f32 1.5, %v1646_v23 }
 0x21a   :  { %v2571_v29 = vpop.eup %2570  ;;  %v1586_v28 = vsub.f32 %v1554_v19, %v1570_v3  ;;  %v1571_v31 = vmul.f32 %v3801_v49, %v3801_v49  ;;  %1841 = vrot.lane.b32.xlu1 %v1807_v12, %s2595_s5 }
 0x21b   :  { %v1654_v24 = vmul.f32 %v2571_v29, %v1601_v32  ;;  %v1648_v33 = vmul.f32 %v2569_v48, %v1647_v27  ;;  %vm1660_vm14 = vweird.f32 %v2571_v29 }
 0x21c   :  { %v1602_v22 = vadd.f32 1e-05, %v1586_v28  ;;  %v1587_v14 = vsub.f32 %v1555_v30, %v1571_v31  ;;  %vm1661_vm0 = vmor %vm1659_vm15, %vm1660_vm14 }
 0x21d   :  { %v1655_v4 = vmul.f32 %v2571_v29, %v1654_v24  ;;  %v1652_v43 = vsel %vm1651_vm13, %v2569_v48, %v1648_v33 }
 0x21e   :  { %2572 = vrsqrt.f32 %v1602_v22  ;;  %v1603_v35 = vadd.f32 1e-05, %v1587_v14  ;;  %v1792_v38 = vmul.f32 %v3810_v34, %v1652_v43  ;;  %vm1669_vm3 = vweird.f32 %v1602_v22 }
 0x21f   :  { %v1656_v40 = vmul.f32 0.5, %v1655_v4  ;;  %v1492_v42 = vpop.xlane.xlu2 %1491  ;;  %v1412_v44 = vpop.xlane.xlu1 %1411 }
 0x220   :  { %2574 = vrsqrt.f32 %v1603_v35  ;;  %v3813_v18 = vmul.f32 0.020408163, %v1412_v44  ;;  %1934 = vperm.xlu2 %2557, %v1792_v38   ;;  %v1556_v50 = vmul.f32 0.020408163, %v1492_v42  ;;  %v1808_v45 = vmul.f32 %v1792_v38, %v3775_v25 }
 0x221   :  { %v1657_v47 = vsub.f32 1.5, %v1656_v40  ;;  %vm1679_vm6 = vweird.f32 %v1603_v35 }
 0x222   :  { %v1572_v52 = vmul.f32 %v3813_v18, %v3813_v18 }
 0x223   :  { %v1658_v20 = vmul.f32 %v2571_v29, %v1657_v47 }
 0x224   :  { %v2573_v54 = vpop.eup %2572  ;;  %v1588_v59 = vsub.f32 %v1556_v50, %v1572_v52 }
 0x225   :  { %v1664_v56 = vmul.f32 %v2573_v54, %v1602_v22  ;;  %v1662_v41 = vsel %vm1661_vm0, %v2571_v29, %v1658_v20  ;;  %vm1670_vm2 = vweird.f32 %v2573_v54 }
 0x226   :  { %v2575_v36 = vpop.eup %2574  ;;  %v1604_v60 = vadd.f32 1e-05, %v1588_v59  ;;  %v1793_v39 = vmul.f32 %v3820_v62, %v1662_v41  ;;  %vm1671_vm5 = vmor %vm1669_vm3, %vm1670_vm2 }
 0x227   :  { %v1665_v61 = vmul.f32 %v2573_v54, %v1664_v56  ;;  %v1674_v37 = vmul.f32 %v2575_v36, %v1603_v35  ;;  %v1495_v63 = vpop.xlane.xlu0 %1494  ;;  %v1415_v1 = vpop.xlane.xlu2 %1414  ;;  %vm1680_vm4 = vweird.f32 %v2575_v36 }
 0x228   :  { %2576 = vrsqrt.f32 %v1604_v60  ;;  %v3824_v0 = vmul.f32 0.020408163, %v1415_v1  ;;  %1843 = vrot.lane.b32.xlu2 %v1808_v45, %s2595_s5  ;;  %1939 = vperm.xlu1 %2558, %v1793_v39   ;;  %v1809_v6 = vmul.f32 %v1793_v39, %v3786_v13  ;;  %v1557_v7 = vmul.f32 0.020408163, %v1495_v63  ;;  %vm1681_vm7 = vmor %vm1679_vm6, %vm1680_vm4 }
 0x229   :  { %v1666_v53 = vmul.f32 0.5, %v1665_v61  ;;  %v1675_v5 = vmul.f32 %v2575_v36, %v1674_v37  ;;  %vm1689_vm9 = vweird.f32 %v1604_v60 }
 0x22a   :  { %v1573_v25 = vmul.f32 %v3824_v0, %v3824_v0  ;;  %1845 = vrot.lane.b32.xlu0 %v1809_v6, %s2595_s5 }
 0x22b   :  { %v1667_v10 = vsub.f32 1.5, %v1666_v53  ;;  %v1676_v11 = vmul.f32 0.5, %v1675_v5 }
 0x22c   :  { %v1589_v55 = vsub.f32 %v1557_v7, %v1573_v25 }
 0x22d   :  { %v1668_v57 = vmul.f32 %v2573_v54, %v1667_v10  ;;  %v1677_v16 = vsub.f32 1.5, %v1676_v11 }
 0x22e   :  { %v2577_v13 = vpop.eup %2576  ;;  %v1605_v48 = vadd.f32 1e-05, %v1589_v55 }
 0x22f   :  { %v1672_v32 = vsel %vm1671_vm5, %v2573_v54, %v1668_v57  ;;  %v1678_v21 = vmul.f32 %v2575_v36, %v1677_v16  ;;  %v1684_v2 = vmul.f32 %v2577_v13, %v1604_v60  ;;  %v1418_v23 = vpop.xlane.xlu0 %1417  ;;  %v1498_v26 = vpop.xlane.xlu1 %1497  ;;  %vm1690_vm8 = vweird.f32 %v2577_v13  ;;  %v3866_v60 = vld [vmem:[%s4109_s2 + $0x40] sm:$0xff] }
 0x230   :  { %v1794_v8 = vmul.f32 %v3834_v15, %v1672_v32  ;;  %2578 = vrsqrt.f32 %v1605_v48  ;;  %v3842_v19 = vmul.f32 0.020408163, %v1418_v23  ;;  %v1558_v30 = vmul.f32 0.020408163, %v1498_v26  ;;  %vm1691_vm10 = vmor %vm1689_vm9, %vm1690_vm8 }
 0x231   :  { %v1682_v3 = vsel %vm1681_vm7, %v2575_v36, %v1678_v21  ;;  %v1685_v12 = vmul.f32 %v2577_v13, %v1684_v2  ;;  %vm1699_vm12 = vweird.f32 %v1605_v48  ;;  %v3878_v21 = vld [vmem:[%s4109_s2 + $0x48] sm:$0xff] }
 0x232   :  { %v1810_v27 = vmul.f32 %v1794_v8, %v3797_v51  ;;  %v1795_v29 = vmul.f32 %v3839_v17, %v1682_v3  ;;  %v1574_v28 = vmul.f32 %v3842_v19, %v3842_v19  ;;  %1944 = vperm.xlu0 %2556, %v1794_v8   ;;  %v3854_v51 = vld [vmem:[%s4109_s2 + $0x38] sm:$0xff] }
 0x233   :  { %v1686_v31 = vmul.f32 0.5, %v1685_v12 }
 0x234   :  { %v1811_v24 = vmul.f32 %v1795_v29, %v3801_v49  ;;  %v1590_v33 = vsub.f32 %v1558_v30, %v1574_v28  ;;  %1847 = vrot.lane.b32.xlu2 %v1810_v27, %s2595_s5 }
 0x235   :  { %v1687_v22 = vsub.f32 1.5, %v1686_v31 }
 0x236   :  { %v2579_v14 = vpop.eup %2578  ;;  %v1606_v4 = vadd.f32 1e-05, %v1590_v33  ;;  %1849 = vrot.lane.b32.xlu1 %v1811_v24, %s2595_s5  ;;  %v3890_v24 = vld [vmem:[%s4109_s2 + $0x50] sm:$0xff] }
 0x237   :  { %v1688_v43 = vmul.f32 %v2577_v13, %v1687_v22  ;;  %v1694_v35 = vmul.f32 %v2579_v14, %v1605_v48  ;;  %v1501_v38 = vpop.xlane.xlu2 %1500  ;;  %v1421_v40 = vpop.xlane.xlu1 %1420  ;;  %vm1700_vm11 = vweird.f32 %v2579_v14 }
 0x238   :  { %2580 = vrsqrt.f32 %v1606_v4  ;;  %v3856_v49 = vmul.f32 0.020408163, %v1421_v40  ;;  %v1559_v50 = vmul.f32 0.020408163, %v1501_v38  ;;  %vm1701_vm13 = vmor %vm1699_vm12, %vm1700_vm11  ;;  %vm1709_vm15 = vweird.f32 %v1606_v4 }
 0x239   :  { %v1692_v42 = vsel %vm1691_vm10, %v2577_v13, %v1688_v43  ;;  %v1695_v44 = vmul.f32 %v2579_v14, %v1694_v35 }
 0x23a   :  { %v1796_v47 = vmul.f32 %v3854_v51, %v1692_v42  ;;  %v1575_v52 = vmul.f32 %v3856_v49, %v3856_v49 }
 0x23b   :  { %v1696_v20 = vmul.f32 0.5, %v1695_v44 }
 0x23c   :  { %v1812_v54 = vmul.f32 %v1796_v47, %v3813_v18  ;;  %v1591_v59 = vsub.f32 %v1559_v50, %v1575_v52  ;;  %1949 = vperm.xlu2 %2557, %v1795_v29  }
 0x23d   :  { %v1697_v56 = vsub.f32 1.5, %v1696_v20 }
 0x23e   :  { %v2581_v41 = vpop.eup %2580  ;;  %v1607_v36 = vadd.f32 1e-05, %v1591_v59  ;;  %1954 = vperm.xlu1 %2558, %v1796_v47   ;;  %1851 = vrot.lane.b32.xlu0 %v1812_v54, %s2595_s5  ;;  %v3902_v59 = vld [vmem:[%s4109_s2 + $0x58] sm:$0xff] }
 0x23f   :  { %v1698_v45 = vmul.f32 %v2579_v14, %v1697_v56  ;;  %v1704_v39 = vmul.f32 %v2581_v41, %v1606_v4  ;;  %v1504_v61 = vpop.xlane.xlu0 %1503  ;;  %v1424_v37 = vpop.xlane.xlu2 %1423  ;;  %vm1710_vm14 = vweird.f32 %v2581_v41 }
 0x240   :  { %2582 = vrsqrt.f32 %v1607_v36  ;;  %v3868_v18 = vmul.f32 0.020408163, %v1424_v37  ;;  %v1560_v5 = vmul.f32 0.020408163, %v1504_v61  ;;  %vm1711_vm0 = vmor %vm1709_vm15, %vm1710_vm14  ;;  %vm1719_vm3 = vweird.f32 %v1607_v36 }
 0x241   :  { %v1702_v63 = vsel %vm1701_vm13, %v2579_v14, %v1698_v45  ;;  %v1705_v1 = vmul.f32 %v2581_v41, %v1704_v39 }
 0x242   :  { %v1797_v53 = vmul.f32 %v3866_v60, %v1702_v63  ;;  %v1576_v6 = vmul.f32 %v3868_v18, %v3868_v18 }
 0x243   :  { %v1706_v7 = vmul.f32 0.5, %v1705_v1 }
 0x244   :  { %v1813_v25 = vmul.f32 %v1797_v53, %v3824_v0  ;;  %v1592_v10 = vsub.f32 %v1560_v5, %v1576_v6 }
 0x245   :  { %v1707_v11 = vsub.f32 1.5, %v1706_v7 }
 0x246   :  { %v2583_v55 = vpop.eup %2582  ;;  %v1608_v57 = vadd.f32 1e-05, %v1592_v10  ;;  %1853 = vrot.lane.b32.xlu2 %v1813_v25, %s2595_s5  ;;  %1959 = vperm.xlu0 %2556, %v1797_v53  }
 0x247   :  { %v1714_v16 = vmul.f32 %v2583_v55, %v1607_v36  ;;  %v1427_v13 = vpop.xlane.xlu0 %1426  ;;  %v1507_v48 = vpop.xlane.xlu1 %1506  ;;  %v1708_v32 = vmul.f32 %v2581_v41, %v1707_v11  ;;  %vm1720_vm2 = vweird.f32 %v2583_v55 }
 0x248   :  { %2584 = vrsqrt.f32 %v1608_v57  ;;  %v3880_v0 = vmul.f32 0.020408163, %v1427_v13  ;;  %v1561_v8 = vmul.f32 0.020408163, %v1507_v48  ;;  %vm1721_vm4 = vmor %vm1719_vm3, %vm1720_vm2  ;;  %vm1729_vm6 = vweird.f32 %v1608_v57 }
 0x249   :  { %v1715_v2 = vmul.f32 %v2583_v55, %v1714_v16  ;;  %v1712_v23 = vsel %vm1711_vm0, %v2581_v41, %v1708_v32  ;;  %v3914_v16 = vld [vmem:[%s4109_s2 + $0x60] sm:$0xff] }
 0x24a   :  { %v1577_v26 = vmul.f32 %v3880_v0, %v3880_v0  ;;  %v1798_v3 = vmul.f32 %v3878_v21, %v1712_v23 }
 0x24b   :  { %v1716_v12 = vmul.f32 0.5, %v1715_v2 }
 0x24c   :  { %v1593_v27 = vsub.f32 %v1561_v8, %v1577_v26  ;;  %v1814_v29 = vmul.f32 %v1798_v3, %v3842_v19 }
 0x24d   :  { %v1717_v28 = vsub.f32 1.5, %v1716_v12 }
 0x24e   :  { %v2585_v30 = vpop.eup %2584  ;;  %v1609_v31 = vadd.f32 1e-05, %v1593_v27  ;;  %1964 = vperm.xlu2 %2557, %v1798_v3   ;;  %1855 = vrot.lane.b32.xlu1 %v1814_v29, %s2595_s5 }
 0x24f   :  { %v1718_v33 = vmul.f32 %v2583_v55, %v1717_v28  ;;  %v1724_v22 = vmul.f32 %v2585_v30, %v1608_v57  ;;  %v1510_v14 = vpop.xlane.xlu2 %1509  ;;  %v1430_v4 = vpop.xlane.xlu1 %1429  ;;  %vm1730_vm5 = vweird.f32 %v2585_v30 }
 0x250   :  { %2586 = vrsqrt.f32 %v1609_v31  ;;  %v3892_v19 = vmul.f32 0.020408163, %v1430_v4  ;;  %v1562_v40 = vmul.f32 0.020408163, %v1510_v14  ;;  %vm1731_vm7 = vmor %vm1729_vm6, %vm1730_vm5  ;;  %vm1739_vm9 = vweird.f32 %v1609_v31 }
 0x251   :  { %v1722_v43 = vsel %vm1721_vm4, %v2583_v55, %v1718_v33  ;;  %v1725_v35 = vmul.f32 %v2585_v30, %v1724_v22 }
 0x252   :  { %v1799_v38 = vmul.f32 %v3890_v24, %v1722_v43  ;;  %v1578_v42 = vmul.f32 %v3892_v19, %v3892_v19 }
 0x253   :  { %v1726_v44 = vmul.f32 0.5, %v1725_v35 }
 0x254   :  { %v1815_v47 = vmul.f32 %v1799_v38, %v3856_v49  ;;  %v1594_v50 = vsub.f32 %v1562_v40, %v1578_v42  ;;  %v3930_v42 = vld [vmem:[%s4109_s2 + $0x70] sm:$0xff] }
 0x255   :  { %v1727_v52 = vsub.f32 1.5, %v1726_v44 }
 0x256   :  { %v2587_v20 = vpop.eup %2586  ;;  %v1610_v54 = vadd.f32 1e-05, %v1594_v50  ;;  %1969 = vperm.xlu1 %2558, %v1799_v38   ;;  %1857 = vrot.lane.b32.xlu0 %v1815_v47, %s2595_s5 }
 0x257   :  { %v1728_v56 = vmul.f32 %v2585_v30, %v1727_v52  ;;  %v1734_v41 = vmul.f32 %v2587_v20, %v1609_v31  ;;  %v1513_v36 = vpop.xlane.xlu0 %1512  ;;  %v1433_v45 = vpop.xlane.xlu2 %1432  ;;  %vm1740_vm8 = vweird.f32 %v2587_v20 }
 0x258   :  { %2588 = vrsqrt.f32 %v1610_v54  ;;  %v3904_v49 = vmul.f32 0.020408163, %v1433_v45  ;;  %v1563_v63 = vmul.f32 0.020408163, %v1513_v36  ;;  %vm1741_vm10 = vmor %vm1739_vm9, %vm1740_vm8  ;;  %vm1749_vm12 = vweird.f32 %v1610_v54 }
 0x259   :  { %v1732_v39 = vsel %vm1731_vm7, %v2585_v30, %v1728_v56  ;;  %v1735_v61 = vmul.f32 %v2587_v20, %v1734_v41  ;;  %v3922_v30 = vld [vmem:[%s4109_s2 + $0x68] sm:$0xff] }
 0x25a   :  { %v1800_v37 = vmul.f32 %v3902_v59, %v1732_v39  ;;  %v1579_v1 = vmul.f32 %v3904_v49, %v3904_v49  ;;  %v3942_v39 = vld [vmem:[%s4109_s2 + $0x78] sm:$0xff] }
 0x25b   :  { %v1736_v53 = vmul.f32 0.5, %v1735_v61  ;;  %v2596_v61 = vmov 1  }
 0x25c   :  { %v1816_v5 = vmul.f32 %v1800_v37, %v3868_v18  ;;  %v1595_v6 = vsub.f32 %v1563_v63, %v1579_v1 }
 0x25d   :  { %v1737_v7 = vsub.f32 1.5, %v1736_v53 }
 0x25e   :  { %v2589_v25 = vpop.eup %2588  ;;  %v1611_v10 = vadd.f32 1e-05, %v1595_v6  ;;  %1859 = vrot.lane.b32.xlu2 %v1816_v5, %s2595_s5  ;;  %1974 = vperm.xlu0 %2556, %v1800_v37  }
 0x25f   :  { %v1744_v11 = vmul.f32 %v2589_v25, %v1610_v54  ;;  %v1436_v55 = vpop.xlane.xlu0 %1435  ;;  %v1738_v57 = vmul.f32 %v2587_v20, %v1737_v7  ;;  %v1516_v18 = vpop.xlane.xlu1 %1515  ;;  %vm1750_vm11 = vweird.f32 %v2589_v25 }
 0x260   :  { %2590 = vrsqrt.f32 %v1611_v10  ;;  %v1548_v13 = vmul.f32 0.020408163, %v1436_v55  ;;  %v1564_v23 = vmul.f32 0.020408163, %v1516_v18  ;;  %vm1751_vm13 = vmor %vm1749_vm12, %vm1750_vm11  ;;  %v1838_v4 = vpop.permute.xlu2 %1837  ;;  %vm1759_vm15 = vweird.f32 %v1611_v10 }
 0x261   :  { %v1745_v48 = vmul.f32 %v2589_v25, %v1744_v11  ;;  %v1742_v32 = vsel %vm1741_vm10, %v2587_v20, %v1738_v57  ;;  %v1885_v6 = vsub.f32 %v3772_v46, %v1838_v4 }
 0x262   :  { %v1580_v2 = vmul.f32 %v1548_v13, %v1548_v13  ;;  %v1801_v26 = vmul.f32 %v3914_v16, %v1742_v32 }
 0x263   :  { %v1746_v8 = vmul.f32 0.5, %v1745_v48 }
 0x264   :  { %v1596_v3 = vsub.f32 %v1564_v23, %v1580_v2  ;;  %v1817_v12 = vmul.f32 %v1801_v26, %v3880_v0 }
 0x265   :  { %v1747_v27 = vsub.f32 1.5, %v1746_v8 }
 0x266   :  { %v2591_v29 = vpop.eup %2590  ;;  %v1612_v28 = vadd.f32 1e-05, %v1596_v3  ;;  %1979 = vperm.xlu2 %2557, %v1801_v26   ;;  %1861 = vrot.lane.b32.xlu1 %v1817_v12, %s2595_s5 }
 0x267   :  { %v1748_v31 = vmul.f32 %v2589_v25, %v1747_v27  ;;  %v1754_v33 = vmul.f32 %v2591_v29, %v1611_v10  ;;  %vm1760_vm14 = vweird.f32 %v2591_v29 }
 0x268   :  { %2592 = vrsqrt.f32 %v1612_v28  ;;  %vm1761_vm0 = vmor %vm1759_vm15, %vm1760_vm14  ;;  %v3934_v56 = vpop.permute.xlu2 %1924  ;;  %vm1769_vm3 = vweird.f32 %v1612_v28 }
 0x269   :  { %v1752_v22 = vsel %vm1751_vm13, %v2589_v25, %v1748_v31  ;;  %v1755_v14 = vmul.f32 %v2591_v29, %v1754_v33 }
 0x26a   :  { %v1802_v0 = vmul.f32 %v3922_v30, %v1752_v22 }
 0x26b   :  { %v1756_v43 = vmul.f32 0.5, %v1755_v14 }
 0x26c   :  { %v1818_v35 = vmul.f32 %v1802_v0, %v3892_v19 }
 0x26d   :  { %v1757_v38 = vsub.f32 1.5, %v1756_v43 }
 0x26e   :  { %v2593_v40 = vpop.eup %2592  ;;  %1984 = vperm.xlu1 %2558, %v1802_v0   ;;  %1863 = vrot.lane.b32.xlu0 %v1818_v35, %s2595_s5 }
 0x26f   :  { %v1758_v44 = vmul.f32 %v2591_v29, %v1757_v38  ;;  %v1764_v47 = vmul.f32 %v2593_v40, %v1612_v28  ;;  %vm1770_vm2 = vweird.f32 %v2593_v40 }
 0x270   :  { %vm1771_vm4 = vmor %vm1769_vm3, %vm1770_vm2 }
 0x271   :  { %v1762_v50 = vsel %vm1761_vm0, %v2591_v29, %v1758_v44  ;;  %v1765_v52 = vmul.f32 %v2593_v40, %v1764_v47 }
 0x272   :  { %v1803_v20 = vmul.f32 %v3930_v42, %v1762_v50 }
 0x273   :  { %v1766_v19 = vmul.f32 0.5, %v1765_v52 }
 0x274   :  { %v1819_v54 = vmul.f32 %v1803_v20, %v3904_v49  ;;  %v3936_v36 = vpop.permute.xlu0 %1919 }
 0x275   :  { %v1767_v41 = vsub.f32 1.5, %v1766_v19  ;;  %v1901_v19 = vld [vmem:[%s4108_s3] sm:$0xff] }
 0x276   :  { %1865 = vrot.lane.b32.xlu2 %v1819_v54, %s2595_s5  ;;  %1989 = vperm.xlu0 %2556, %v1803_v20   ;;  %v1997_v54 = vmul.f32 %v3936_v36, %v1901_v19  ;;  %v1904_v36 = vld [vmem:[%s4108_s3 + $0x18] sm:$0xff] }
 0x277   :  { %v1768_v45 = vmul.f32 %v2593_v40, %v1767_v41  ;;  %2559 = vset.pattern.permute.xlu1 %v2596_v61  ;;  %v1905_v41 = vld [vmem:[%s4108_s3 + $0x20] sm:$0xff] }
 0x279   :  { %v1772_v49 = vsel %vm1771_vm4, %v2593_v40, %v1768_v45 }
 0x27a   :  { %v1804_v37 = vmul.f32 %v3942_v39, %v1772_v49  ;;  %v3945_v63 = vpop.permute.xlu2 %1934 }
 0x27c   :  { %v1820_v1 = vmul.f32 %v1804_v37, %v1548_v13 }
 0x27e   :  { %v1840_v53 = vpop.permute.xlu0 %1839  ;;  %1994 = vperm.xlu2 %2557, %v1804_v37   ;;  %1867 = vrot.lane.b32.xlu1 %v1820_v1, %s2595_s5  ;;  %v2000_v37 = vmul.f32 %v3945_v63, %v1904_v36 }
 0x27f   :  { %v1886_v5 = vsub.f32 %v3781_v58, %v1840_v53  ;;  %2560 = vset.pattern.permute.xlu0 %v2596_v61 }
 0x281   :  { %2020 = vperm.xlu0 %2560, %v1886_v5   ;;  %v1906_v5 = vld [vmem:[%s4108_s3 + $0x28] sm:$0xff] }
 0x282   :  { %v1844_v25 = vpop.permute.xlu2 %1843 }
 0x283   :  { %v1888_v10 = vsub.f32 %v3810_v34, %v1844_v25 }
 0x284   :  { %v1930_v7 = vpop.permute.xlu1 %1929 }
 0x286   :  { %2015 = vperm.xlu1 %2559, %v1885_v6   ;;  %2561 = vset.pattern.permute.xlu2 %v2596_v61 }
 0x28c   :  { %v1842_v11 = vpop.permute.xlu1 %1841 }
 0x28d   :  { %v1887_v55 = vsub.f32 %v3792_v9, %v1842_v11 }
 0x28e   :  { %v1848_v57 = vpop.permute.xlu2 %1847  ;;  %2030 = vperm.xlu1 %2559, %v1888_v10   ;;  %v1908_v10 = vld [vmem:[%s4108_s3 + $0x38] sm:$0xff] }
 0x28f   :  { %2025 = vperm.xlu2 %2561, %v1887_v55   ;;  %v1890_v13 = vsub.f32 %v3834_v15, %v1848_v57  ;;  %v1909_v57 = vld [vmem:[%s4108_s3 + $0x40] sm:$0xff] }
 0x296   :  { %2040 = vperm.xlu1 %2559, %v1890_v13   ;;  %v3953_v58 = vpop.permute.xlu2 %1949 }
 0x29a   :  { %v1940_v48 = vpop.permute.xlu1 %1939 }
 0x29c   :  { %v1846_v18 = vpop.permute.xlu0 %1845 }
 0x29d   :  { %v1889_v46 = vsub.f32 %v3820_v62, %v1846_v18 }
 0x29f   :  { %2035 = vperm.xlu2 %2561, %v1889_v46  }
 0x2a0   :  { %v1854_v32 = vpop.permute.xlu2 %1853 }
 0x2a1   :  { %v1893_v2 = vsub.f32 %v3866_v60, %v1854_v32 }
 0x2a3   :  { %2055 = vperm.xlu1 %2559, %v1893_v2  }
 0x2a4   :  { %v3957_v34 = vpop.permute.xlu0 %1944 }
 0x2a5   :  { %v2002_v6 = vmul.f32 %v3957_v34, %v1906_v5 }
 0x2a8   :  { %v1850_v9 = vpop.permute.xlu1 %1849  ;;  %v3960_v26 = vpop.permute.xlu2 %1964 }
 0x2a9   :  { %v1891_v23 = vsub.f32 %v3839_v17, %v1850_v9  ;;  %v1911_v9 = vld [vmem:[%s4108_s3 + $0x50] sm:$0xff] }
 0x2ab   :  { %2045 = vperm.xlu0 %2560, %v1891_v23  }
 0x2b0   :  { %v1852_v15 = vpop.permute.xlu0 %1851  ;;  %v1955_v3 = vpop.permute.xlu1 %1954 }
 0x2b1   :  { %v1892_v8 = vsub.f32 %v3854_v51, %v1852_v15  ;;  %v2004_v63 = vmul.f32 %v1955_v3, %v1908_v10 }
 0x2b3   :  { %2050 = vperm.xlu2 %2561, %v1892_v8  }
 0x2b8   :  { %v1860_v62 = vpop.permute.xlu2 %1859  ;;  %v1960_v27 = vpop.permute.xlu0 %1959 }
 0x2b9   :  { %v1896_v12 = vsub.f32 %v3902_v59, %v1860_v62  ;;  %v2005_v13 = vmul.f32 %v1960_v27, %v1909_v57  ;;  %v1910_v27 = vld [vmem:[%s4108_s3 + $0x48] sm:$0xff] }
 0x2bb   :  { %2070 = vperm.xlu1 %2559, %v1896_v12  }
 0x2c0   :  { %v1856_v60 = vpop.permute.xlu1 %1855  ;;  %v3965_v28 = vpop.permute.xlu2 %1979 }
 0x2c1   :  { %v1894_v29 = vsub.f32 %v3878_v21, %v1856_v60  ;;  %v2006_v60 = vmul.f32 %v3960_v26, %v1910_v27  ;;  %v1915_v26 = vld [vmem:[%s4108_s3 + $0x70] sm:$0xff] }
 0x2c3   :  { %2060 = vperm.xlu0 %2560, %v1894_v29  }
 0x2c8   :  { %v1858_v17 = vpop.permute.xlu0 %1857  ;;  %v3968_v33 = vpop.permute.xlu1 %1969 }
 0x2c9   :  { %v1895_v31 = vsub.f32 %v3890_v24, %v1858_v17  ;;  %v1903_v24 = vld [vmem:[%s4108_s3 + $0x10] sm:$0xff]  ;;  %v2007_v23 = vmul.f32 %v3968_v33, %v1911_v9 }
 0x2ca   :  { %v1999_v35 = vmul.f32 %v1930_v7, %v1903_v24 }
 0x2cb   :  { %2065 = vperm.xlu2 %2561, %v1895_v31   ;;  %v1914_v31 = vld [vmem:[%s4108_s3 + $0x68] sm:$0xff] }
 0x2d0   :  { %v1866_v51 = vpop.permute.xlu2 %1865  ;;  %v3971_v14 = vpop.permute.xlu0 %1974 }
 0x2d1   :  { %v1899_v22 = vsub.f32 %v3930_v42, %v1866_v51 }
 0x2d3   :  { %2085 = vperm.xlu1 %2559, %v1899_v22  }
 0x2d8   :  { %v1862_v59 = vpop.permute.xlu1 %1861  ;;  %v3974_v4 = vpop.permute.xlu2 %1994 }
 0x2d9   :  { %v1897_v0 = vsub.f32 %v3914_v16, %v1862_v59 }
 0x2db   :  { %2075 = vperm.xlu0 %2560, %v1897_v0  }
 0x2e0   :  { %v1864_v21 = vpop.permute.xlu0 %1863  ;;  %v3980_v38 = vpop.permute.xlu1 %1984 }
 0x2e1   :  { %v1898_v43 = vsub.f32 %v3922_v30, %v1864_v21  ;;  %v1902_v30 = vld [vmem:[%s4108_s3 + $0x8] sm:$0xff]  ;;  %v2010_v33 = vmul.f32 %v3980_v38, %v1914_v31  ;;  %v1913_v21 = vld [vmem:[%s4108_s3 + $0x60] sm:$0xff]  ;;  %v1916_v38 = vld [vmem:[%s4108_s3 + $0x78] sm:$0xff] }
 0x2e2   :  { %v1998_v50 = vmul.f32 %v3934_v56, %v1902_v30  ;;  %v2001_v56 = vmul.f32 %v1940_v48, %v1905_v41  ;;  %v1907_v48 = vld [vmem:[%s4108_s3 + $0x30] sm:$0xff] }
 0x2e3   :  { %2080 = vperm.xlu2 %2561, %v1898_v43   ;;  %v2003_v32 = vmul.f32 %v3953_v58, %v1907_v48  ;;  %v1912_v58 = vld [vmem:[%s4108_s3 + $0x58] sm:$0xff]  ;;  %v2009_v43 = vmul.f32 %v3965_v28, %v1913_v21 }
 0x2e4   :  { %v2008_v3 = vmul.f32 %v3971_v14, %v1912_v58 }
 0x2e8   :  { %v3982_v44 = vpop.permute.xlu0 %1989 }
 0x2e9   :  { %v2026_v40 = vpop.permute.xlu2 %2025  ;;  %v2011_v14 = vmul.f32 %v3982_v44, %v1915_v26 }
 0x2ea   :  { %v2095_v42 = vadd.f32 %v2026_v40, %v1999_v35  ;;  %v2012_v40 = vmul.f32 %v3974_v4, %v1916_v38 }
 0x2ec   :  { %2111 = vst.msk [vmem:[%s4108_s3 + $0x10] sm:$0xff] %vm1372_vm1, %v2095_v42 }
 0x2f0   :  { %v1868_v16 = vpop.permute.xlu1 %1867 }
 0x2f1   :  { %v1900_v47 = vsub.f32 %v3942_v39, %v1868_v16 }
 0x2f3   :  { %v2021_v52 = vpop.permute.xlu0 %2020  ;;  %2090 = vperm.xlu0 %2560, %v1900_v47  }
 0x2f4   :  { %v2094_v20 = vadd.f32 %v2021_v52, %v1998_v50 }
 0x2f6   :  { %2110 = vst.msk [vmem:[%s4108_s3 + $0x8] sm:$0xff] %vm1372_vm1, %v2094_v20 }
 0x2f8   :  { %v2016_v45 = vpop.permute.xlu1 %2015 }
 0x2f9   :  { %v2093_v39 = vadd.f32 %v2016_v45, %v1997_v54  ;;  %v2036_v61 = vpop.permute.xlu2 %2035 }
 0x2fa   :  { %v2097_v49 = vadd.f32 %v2036_v61, %v2001_v56 }
 0x2fb   :  { %2109 = vst.msk [vmem:[%s4108_s3] sm:$0xff] %vm1372_vm1, %v2093_v39 }
 0x2fc   :  { %2113 = vst.msk [vmem:[%s4108_s3 + $0x20] sm:$0xff] %vm1372_vm1, %v2097_v49 }
 0x300   :  { %v2031_v1 = vpop.permute.xlu1 %2030 }
 0x301   :  { %v2096_v53 = vadd.f32 %v2031_v1, %v2000_v37 }
 0x303   :  { %2112 = vst.msk [vmem:[%s4108_s3 + $0x18] sm:$0xff] %vm1372_vm1, %v2096_v53 }
 0x308   :  { %v2041_v7 = vpop.permute.xlu1 %2040 }
 0x309   :  { %v2098_v25 = vadd.f32 %v2041_v7, %v2002_v6 }
 0x30b   :  { %2114 = vst.msk [vmem:[%s4108_s3 + $0x28] sm:$0xff] %vm1372_vm1, %v2098_v25 }
 0x30d   :  { %v2051_v11 = vpop.permute.xlu2 %2050 }
 0x30e   :  { %v2100_v55 = vadd.f32 %v2051_v11, %v2004_v63 }
 0x310   :  { %2116 = vst.msk [vmem:[%s4108_s3 + $0x38] sm:$0xff] %vm1372_vm1, %v2100_v55 }
 0x315   :  { %v2056_v18 = vpop.permute.xlu1 %2055 }
 0x316   :  { %v2101_v46 = vadd.f32 %v2056_v18, %v2005_v13 }
 0x318   :  { %2117 = vst.msk [vmem:[%s4108_s3 + $0x40] sm:$0xff] %vm1372_vm1, %v2101_v46 }
 0x31d   :  { %v2046_v2 = vpop.permute.xlu0 %2045 }
 0x31e   :  { %v2099_v34 = vadd.f32 %v2046_v2, %v2003_v32 }
 0x320   :  { %2115 = vst.msk [vmem:[%s4108_s3 + $0x30] sm:$0xff] %vm1372_vm1, %v2099_v34 }
 0x325   :  { %v2066_v15 = vpop.permute.xlu2 %2065 }
 0x326   :  { %v2103_v8 = vadd.f32 %v2066_v15, %v2007_v23 }
 0x328   :  { %2119 = vst.msk [vmem:[%s4108_s3 + $0x50] sm:$0xff] %vm1372_vm1, %v2103_v8 }
 0x32d   :  { %v2071_v62 = vpop.permute.xlu1 %2070 }
 0x32e   :  { %v2104_v12 = vadd.f32 %v2071_v62, %v2008_v3 }
 0x330   :  { %2120 = vst.msk [vmem:[%s4108_s3 + $0x58] sm:$0xff] %vm1372_vm1, %v2104_v12 }
 0x335   :  { %v2061_v29 = vpop.permute.xlu0 %2060 }
 0x336   :  { %v2102_v17 = vadd.f32 %v2061_v29, %v2006_v60 }
 0x338   :  { %2118 = vst.msk [vmem:[%s4108_s3 + $0x48] sm:$0xff] %vm1372_vm1, %v2102_v17 }
 0x33d   :  { %v2081_v51 = vpop.permute.xlu2 %2080 }
 0x33e   :  { %v2106_v22 = vadd.f32 %v2081_v51, %v2010_v33 }
 0x340   :  { %2122 = vst.msk [vmem:[%s4108_s3 + $0x68] sm:$0xff] %vm1372_vm1, %v2106_v22 }
 0x345   :  { %v2086_v59 = vpop.permute.xlu1 %2085 }
 0x346   :  { %v2107_v0 = vadd.f32 %v2086_v59, %v2011_v14 }
 0x348   :  { %2123 = vst.msk [vmem:[%s4108_s3 + $0x70] sm:$0xff] %vm1372_vm1, %v2107_v0 }
 0x34d   :  { %v2076_v24 = vpop.permute.xlu0 %2075 }
 0x34e   :  { %v2105_v35 = vadd.f32 %v2076_v24, %v2009_v43 }
 0x350   :  { %2121 = vst.msk [vmem:[%s4108_s3 + $0x60] sm:$0xff] %vm1372_vm1, %v2105_v35 }
 0x365   :  { %v2091_v42 = vpop.permute.xlu0 %2090 }
 0x366   :  { %v2108_v44 = vadd.f32 %v2091_v42, %v2012_v40 }
 0x368   :  { %2124 = vst.msk [vmem:[%s4108_s3 + $0x78] sm:$0xff] %vm1372_vm1, %v2108_v44 }

</bundles_post_ra>
